<compile_context>
chip_gen: v5e
topology: v5e:2x2
jax: 0.10.0
libtpu: 0.0.40
codegen_flags: <defaults>
</compile_context>

<pallas_src>
import math

import jax
import jax.numpy as jnp
from jax.experimental import pallas as pl
from jax.experimental.pallas import tpu as pltpu

# ---- small DistilBERT-like config (synthetic, deterministic init) -----------
B, S = 2, 8            # batch, sequence length
H = 32                 # hidden size
N_HEADS = 4
HEAD_DIM = H // N_HEADS
FFN = 64               # intermediate size
N_LAYERS = 2
VOCAB = 100
MAX_POS = 16
N_CLASSES = 3
N_PAD = 128            # lane-dense classifier output width (sliced to N_CLASSES outside)
LN_EPS = 1e-12
DROPOUT_P = 0.1        # nn.Dropout(p=...) -> identity at inference


# ---------------------------- in-kernel helpers ------------------------------
def _layer_norm(x, g, b):
    # x: (R, H) f32; g, b: (1, H) f32
    mu = jnp.mean(x, axis=-1, keepdims=True)
    var = jnp.mean((x - mu) ** 2, axis=-1, keepdims=True)
    return (x - mu) * jax.lax.rsqrt(var + LN_EPS) * g + b


def _gelu(x):
    # TODO(synk): HF DistilBERT uses exact erf-based GELU; tanh approximation used here.
    return 0.5 * x * (1.0 + jnp.tanh(0.7978845608028654 * (x + 0.044715 * x * x * x)))


# ------------------------------- fused kernel --------------------------------
def bert_fwd_kernel(x_ref, maskb_ref, embln_ref,
                    wqkv_ref, bqkv_ref, wo_ref, w1_ref, b1_ref, w2_ref, vec_ref,
                    fcw_ref, fcb_ref, o_ref):
    # ---- embedding LayerNorm (f32) ------------------------------------------
    embln = embln_ref[...]                                        # (2, H): gamma, beta
    x = _layer_norm(x_ref[...], embln[0:1, :], embln[1:2, :])     # (B*S, H) f32

    mask_bias = maskb_ref[...]                                    # (B, 1, S) additive bias
    inv_sqrt_d = 1.0 / math.sqrt(HEAD_DIM)

    for li in range(N_LAYERS):                                    # static unroll over layers
        vec = vec_ref[li]                                         # (6, H): bo,ln1g,ln1b,b2,ln2g,ln2b

        # ---- multi-head self-attention (fused QKV, batched over B) ----------
        qkv = jnp.dot(x.astype(jnp.bfloat16), wqkv_ref[li],
                      preferred_element_type=jnp.float32) + bqkv_ref[li]      # (B*S, 3H) f32
        q = (qkv[:, 0:H] * inv_sqrt_d).reshape(B, S, H)           # pre-scaled once
        k = qkv[:, H:2 * H].reshape(B, S, H)
        v = qkv[:, 2 * H:3 * H].reshape(B, S, H)

        ctx_heads = []
        for h in range(N_HEADS):                                  # static unroll over heads
            c0 = h * HEAD_DIM
            qh = q[:, :, c0:c0 + HEAD_DIM].astype(jnp.bfloat16)
            kh = k[:, :, c0:c0 + HEAD_DIM].astype(jnp.bfloat16)
            vh = v[:, :, c0:c0 + HEAD_DIM].astype(jnp.bfloat16)
            # contraction over head_dim of both operands -> no materialized transpose
            scores = jnp.einsum("bqd,bkd->bqk", qh, kh,
                                preferred_element_type=jnp.float32)           # (B, S, S) f32
            scores = scores + mask_bias                           # additive padding mask
            scores = scores - jnp.max(scores, axis=-1, keepdims=True)
            p = jnp.exp(scores)
            p = p * pl.reciprocal(jnp.sum(p, axis=-1, keepdims=True), approx=True)
            ctx_heads.append(jnp.einsum("bqk,bkd->bqd", p.astype(jnp.bfloat16), vh,
                                        preferred_element_type=jnp.float32))  # (B, S, Dh)
        ctx = jnp.concatenate(ctx_heads, axis=-1).reshape(B * S, H)           # (B*S, H) f32

        sa = jnp.dot(ctx.astype(jnp.bfloat16), wo_ref[li],
                     preferred_element_type=jnp.float32) + vec[0:1, :]        # out proj + bo
        h1 = _layer_norm(sa + x, vec[1:2, :], vec[2:3, :])                    # sa_layer_norm

        # ---- feed-forward -----------------------------------------------------
        ff = _gelu(jnp.dot(h1.astype(jnp.bfloat16), w1_ref[li],
                           preferred_element_type=jnp.float32) + b1_ref[li])
        ff = jnp.dot(ff.astype(jnp.bfloat16), w2_ref[li],
                     preferred_element_type=jnp.float32) + vec[3:4, :]
        x = _layer_norm(ff + h1, vec[4:5, :], vec[5:6, :])                    # output_layer_norm

    # ---- CLS pooling + dropout(identity at eval) + classifier ----------------
    pooled = jnp.concatenate([x[b * S:b * S + 1, :] for b in range(B)], axis=0)   # (B, H)
    o_ref[...] = (jnp.dot(pooled.astype(jnp.bfloat16), fcw_ref[...],
                          preferred_element_type=jnp.float32) + fcb_ref[...])     # (B, N_PAD)


# ------------------------------ parameters -----------------------------------
def init_params(key):
    def dense(k, fan_in, fan_out):
        k1, k2 = jax.random.split(k)
        w = jax.random.normal(k1, (fan_in, fan_out), jnp.float32) * 0.02
        b = jax.random.normal(k2, (fan_out,), jnp.float32) * 0.02
        return w, b

    keys = jax.random.split(key, 3 + N_LAYERS)
    params = {
        "word_emb": jax.random.normal(keys[0], (VOCAB, H), jnp.float32) * 0.02,
        "pos_emb": jax.random.normal(keys[1], (MAX_POS, H), jnp.float32) * 0.02,
        "emb_ln": jnp.stack([jnp.ones((H,), jnp.float32),
                             jnp.zeros((H,), jnp.float32)], axis=0),          # (2, H)
    }

    wqkv_l, bqkv_l, wo_l, w1_l, b1_l, w2_l, vec_l = [], [], [], [], [], [], []
    for li in range(N_LAYERS):
        lk = jax.random.split(keys[2 + li], 6)
        wq, bq = dense(lk[0], H, H)
        wk, bk = dense(lk[1], H, H)
        wv, bv = dense(lk[2], H, H)
        wo, bo = dense(lk[3], H, H)
        w1, b1 = dense(lk[4], H, FFN)
        w2, b2 = dense(lk[5], FFN, H)
        ln1g, ln1b = jnp.ones((H,), jnp.float32), jnp.zeros((H,), jnp.float32)
        ln2g, ln2b = jnp.ones((H,), jnp.float32), jnp.zeros((H,), jnp.float32)
        wqkv_l.append(jnp.concatenate([wq, wk, wv], axis=1))                  # (H, 3H)
        bqkv_l.append(jnp.concatenate([bq, bk, bv], axis=0)[None, :])         # (1, 3H)
        wo_l.append(wo)
        w1_l.append(w1)
        b1_l.append(b1[None, :])                                              # (1, FFN)
        w2_l.append(w2)
        vec_l.append(jnp.stack([bo, ln1g, ln1b, b2, ln2g, ln2b], axis=0))     # (6, H)

    # big matmul weights stored in bf16 (MXU native); biases / LN params stay f32
    params["wqkv"] = jnp.stack(wqkv_l).astype(jnp.bfloat16)   # (L, H, 3H)
    params["bqkv"] = jnp.stack(bqkv_l)                        # (L, 1, 3H)
    params["wo"] = jnp.stack(wo_l).astype(jnp.bfloat16)       # (L, H, H)
    params["w1"] = jnp.stack(w1_l).astype(jnp.bfloat16)       # (L, H, FFN)
    params["b1"] = jnp.stack(b1_l)                            # (L, 1, FFN)
    params["w2"] = jnp.stack(w2_l).astype(jnp.bfloat16)       # (L, FFN, H)
    params["vec"] = jnp.stack(vec_l)                          # (L, 6, H)

    fc_w, fc_b = dense(keys[2 + N_LAYERS], H, N_CLASSES)
    fc_w_pad = jnp.zeros((H, N_PAD), jnp.float32).at[:, :N_CLASSES].set(fc_w)
    fc_b_pad = jnp.zeros((1, N_PAD), jnp.float32).at[0, :N_CLASSES].set(fc_b)
    params["fc_w"] = fc_w_pad.astype(jnp.bfloat16)            # lane-dense classifier
    params["fc_b"] = fc_b_pad
    return params


# ------------------------------ forward pass ----------------------------------
def bert_classifier_forward(params, input_ids, attention_mask):
    # Embedding gather (data-dependent gather stays in plain JAX glue).
    pos = jnp.arange(S)
    emb = params["word_emb"][input_ids] + params["pos_emb"][pos][None, :, :]   # (B, S, H)
    x = emb.reshape(B * S, H)
    # Additive attention-mask bias: 0.0 = keep, -1e9 = masked.
    mask_bias = ((attention_mask.astype(jnp.float32) - 1.0) * 1e9).reshape(B, 1, S)

    args = (x, mask_bias, params["emb_ln"],
            params["wqkv"], params["bqkv"], params["wo"],
            params["w1"], params["b1"], params["w2"], params["vec"],
            params["fc_w"], params["fc_b"])

    logits_pad = pl.pallas_call(
        bert_fwd_kernel,
        out_shape=jax.ShapeDtypeStruct((B, N_PAD), jnp.float32),
        in_specs=[pl.BlockSpec(memory_space=pltpu.MemorySpace.VMEM)] * len(args),
        out_specs=pl.BlockSpec(memory_space=pltpu.MemorySpace.VMEM),
    )(*args)
    # self.drop: nn.Dropout(p=DROPOUT_P) is identity at inference; self.fc applied in-kernel.
    return logits_pad[:, :N_CLASSES]


# ---------------------------------- main --------------------------------------
if __name__ == "__main__":
    key = jax.random.PRNGKey(0)
    k_param, k_ids = jax.random.split(key)

    params = init_params(k_param)
    input_ids = jax.random.randint(k_ids, (B, S), 0, VOCAB, dtype=jnp.int32)
    attention_mask = jnp.ones((B, S), jnp.int32).at[1, S - 2:].set(0)  # pad last 2 of batch 1

    fwd = jax.jit(bert_classifier_forward)
    logits = fwd(params, input_ids, attention_mask)
    jax.block_until_ready(logits)
    assert logits.shape == (B, N_CLASSES)
    print("KERNEL_OK")
</pallas_src>

<mosaic_0001>
module attributes {stable_mosaic.version = 11 : i64} {
  func.func @bert_fwd_kernel(%arg0: memref<16x32xf32, #tpu.memory_space<vmem>>, %arg1: memref<2x1x8xf32, #tpu.memory_space<vmem>>, %arg2: memref<2x32xf32, #tpu.memory_space<vmem>>, %arg3: memref<2x32x96xbf16, #tpu.memory_space<vmem>>, %arg4: memref<2x1x96xf32, #tpu.memory_space<vmem>>, %arg5: memref<2x32x32xbf16, #tpu.memory_space<vmem>>, %arg6: memref<2x32x64xbf16, #tpu.memory_space<vmem>>, %arg7: memref<2x1x64xf32, #tpu.memory_space<vmem>>, %arg8: memref<2x64x32xbf16, #tpu.memory_space<vmem>>, %arg9: memref<2x6x32xf32, #tpu.memory_space<vmem>>, %arg10: memref<32x128xbf16, #tpu.memory_space<vmem>>, %arg11: memref<1x128xf32, #tpu.memory_space<vmem>>, %arg12: memref<2x128xf32, #tpu.memory_space<vmem>>) attributes {dimension_semantics = [], scalar_prefetch = 0 : i64, scratch_operands = 0 : i64, tpu.core_type = #tpu.core_type<tc>} {
    %c0 = arith.constant 0 : index
    %c0_0 = arith.constant 0 : index
    %0 = vector.load %arg2[%c0, %c0_0] : memref<2x32xf32, #tpu.memory_space<vmem>>, vector<2x32xf32>
    %c0_1 = arith.constant 0 : index
    %c0_2 = arith.constant 0 : index
    %1 = vector.load %arg0[%c0_1, %c0_2] : memref<16x32xf32, #tpu.memory_space<vmem>>, vector<16x32xf32>
    %2 = vector.extract_strided_slice %0 {offsets = [0, 0], sizes = [1, 32], strides = [1, 1]} : vector<2x32xf32> to vector<1x32xf32>
    %3 = vector.extract_strided_slice %0 {offsets = [1, 0], sizes = [1, 32], strides = [1, 1]} : vector<2x32xf32> to vector<1x32xf32>
    %cst = arith.constant dense<0.000000e+00> : vector<16xf32>
    %4 = vector.multi_reduction <add>, %1, %cst [1] : vector<16x32xf32> to vector<16xf32>
    %5 = vector.shape_cast %4 : vector<16xf32> to vector<16x1xf32>
    %cst_3 = arith.constant 3.200000e+01 : f32
    %6 = vector.broadcast %cst_3 : f32 to vector<16x1xf32>
    %7 = arith.divf %5, %6 : vector<16x1xf32>
    %8 = vector.broadcast %7 : vector<16x1xf32> to vector<16x32xf32>
    %9 = arith.subf %1, %8 : vector<16x32xf32>
    %10 = arith.mulf %9, %9 : vector<16x32xf32>
    %cst_4 = arith.constant dense<0.000000e+00> : vector<16xf32>
    %11 = vector.multi_reduction <add>, %10, %cst_4 [1] : vector<16x32xf32> to vector<16xf32>
    %12 = vector.shape_cast %11 : vector<16xf32> to vector<16x1xf32>
    %cst_5 = arith.constant 3.200000e+01 : f32
    %13 = vector.broadcast %cst_5 : f32 to vector<16x1xf32>
    %14 = arith.divf %12, %13 : vector<16x1xf32>
    %15 = vector.broadcast %7 : vector<16x1xf32> to vector<16x32xf32>
    %16 = arith.subf %1, %15 : vector<16x32xf32>
    %cst_6 = arith.constant 9.99999996E-13 : f32
    %17 = vector.broadcast %cst_6 : f32 to vector<16x1xf32>
    %18 = arith.addf %14, %17 : vector<16x1xf32>
    %19 = math.rsqrt %18 : vector<16x1xf32>
    %20 = vector.broadcast %19 : vector<16x1xf32> to vector<16x32xf32>
    %21 = arith.mulf %16, %20 : vector<16x32xf32>
    %22 = vector.broadcast %2 : vector<1x32xf32> to vector<16x32xf32>
    %23 = arith.mulf %21, %22 : vector<16x32xf32>
    %24 = vector.broadcast %3 : vector<1x32xf32> to vector<16x32xf32>
    %25 = arith.addf %23, %24 : vector<16x32xf32>
    %c0_7 = arith.constant 0 : index
    %c0_8 = arith.constant 0 : index
    %c0_9 = arith.constant 0 : index
    %26 = vector.load %arg1[%c0_7, %c0_8, %c0_9] : memref<2x1x8xf32, #tpu.memory_space<vmem>>, vector<2x1x8xf32>
    %c0_10 = arith.constant 0 : index
    %c0_11 = arith.constant 0 : index
    %c0_12 = arith.constant 0 : index
    %27 = vector.load %arg9[%c0_10, %c0_11, %c0_12] : memref<2x6x32xf32, #tpu.memory_space<vmem>>, vector<1x6x32xf32>
    %28 = vector.shape_cast %27 : vector<1x6x32xf32> to vector<6x32xf32>
    %29 = arith.truncf %25 : vector<16x32xf32> to vector<16x32xbf16>
    %c0_13 = arith.constant 0 : index
    %c0_14 = arith.constant 0 : index
    %c0_15 = arith.constant 0 : index
    %30 = vector.load %arg3[%c0_13, %c0_14, %c0_15] : memref<2x32x96xbf16, #tpu.memory_space<vmem>>, vector<1x32x96xbf16>
    %31 = vector.shape_cast %30 : vector<1x32x96xbf16> to vector<32x96xbf16>
    %cst_16 = arith.constant dense<0.000000e+00> : vector<16x96xf32>
    %32 = tpu.matmul %29, %31, %cst_16 {dimension_numbers = #tpu.dot_dimension_numbers<[1], [0], [0], [1], [0, 0, 1, 1], [], []>} : vector<16x32xbf16>, vector<32x96xbf16>, vector<16x96xf32> -> vector<16x96xf32>
    %c0_17 = arith.constant 0 : index
    %c0_18 = arith.constant 0 : index
    %c0_19 = arith.constant 0 : index
    %33 = vector.load %arg4[%c0_17, %c0_18, %c0_19] : memref<2x1x96xf32, #tpu.memory_space<vmem>>, vector<1x1x96xf32>
    %34 = vector.shape_cast %33 : vector<1x1x96xf32> to vector<1x96xf32>
    %35 = vector.broadcast %34 : vector<1x96xf32> to vector<16x96xf32>
    %36 = arith.addf %32, %35 : vector<16x96xf32>
    %37 = vector.extract_strided_slice %36 {offsets = [0, 0], sizes = [16, 32], strides = [1, 1]} : vector<16x96xf32> to vector<16x32xf32>
    %cst_20 = arith.constant 0.353553385 : f32
    %38 = vector.broadcast %cst_20 : f32 to vector<16x32xf32>
    %39 = arith.mulf %37, %38 : vector<16x32xf32>
    %40 = vector.shape_cast %39 : vector<16x32xf32> to vector<2x8x32xf32>
    %41 = vector.extract_strided_slice %36 {offsets = [0, 32], sizes = [16, 32], strides = [1, 1]} : vector<16x96xf32> to vector<16x32xf32>
    %42 = vector.shape_cast %41 : vector<16x32xf32> to vector<2x8x32xf32>
    %43 = vector.extract_strided_slice %36 {offsets = [0, 64], sizes = [16, 32], strides = [1, 1]} : vector<16x96xf32> to vector<16x32xf32>
    %44 = vector.shape_cast %43 : vector<16x32xf32> to vector<2x8x32xf32>
    %45 = vector.extract_strided_slice %40 {offsets = [0, 0, 0], sizes = [2, 8, 8], strides = [1, 1, 1]} : vector<2x8x32xf32> to vector<2x8x8xf32>
    %46 = arith.truncf %45 : vector<2x8x8xf32> to vector<2x8x8xbf16>
    %47 = vector.extract_strided_slice %42 {offsets = [0, 0, 0], sizes = [2, 8, 8], strides = [1, 1, 1]} : vector<2x8x32xf32> to vector<2x8x8xf32>
    %48 = arith.truncf %47 : vector<2x8x8xf32> to vector<2x8x8xbf16>
    %49 = vector.extract_strided_slice %44 {offsets = [0, 0, 0], sizes = [2, 8, 8], strides = [1, 1, 1]} : vector<2x8x32xf32> to vector<2x8x8xf32>
    %50 = arith.truncf %49 : vector<2x8x8xf32> to vector<2x8x8xbf16>
    "tpu.trace_start"() <{level = 10 : i32, message = "bqd,bkd->bqk"}> : () -> ()
    %cst_21 = arith.constant dense<0.000000e+00> : vector<2x8x8xf32>
    %51 = tpu.matmul %46, %48, %cst_21 {dimension_numbers = #tpu.dot_dimension_numbers<[2], [2], [1], [1], [0, 0, 0, 1, 1, 1], [0], [0]>} : vector<2x8x8xbf16>, vector<2x8x8xbf16>, vector<2x8x8xf32> -> vector<2x8x8xf32>
    "tpu.trace_stop"() : () -> ()
    %52 = vector.broadcast %26 : vector<2x1x8xf32> to vector<2x8x8xf32>
    %53 = arith.addf %51, %52 : vector<2x8x8xf32>
    %cst_22 = arith.constant dense<0xFF800000> : vector<2x8xf32>
    %54 = vector.multi_reduction <maximumf>, %53, %cst_22 [2] : vector<2x8x8xf32> to vector<2x8xf32>
    %55 = vector.shape_cast %54 : vector<2x8xf32> to vector<2x8x1xf32>
    %56 = vector.broadcast %55 : vector<2x8x1xf32> to vector<2x8x8xf32>
    %57 = arith.subf %53, %56 : vector<2x8x8xf32>
    %58 = math.exp %57 : vector<2x8x8xf32>
    %cst_23 = arith.constant dense<0.000000e+00> : vector<2x8xf32>
    %59 = vector.multi_reduction <add>, %58, %cst_23 [2] : vector<2x8x8xf32> to vector<2x8xf32>
    %60 = vector.shape_cast %59 : vector<2x8xf32> to vector<2x8x1xf32>
    %61 = tpu.reciprocal %60 {approx = true} : vector<2x8x1xf32> -> vector<2x8x1xf32>
    %62 = vector.broadcast %61 : vector<2x8x1xf32> to vector<2x8x8xf32>
    %63 = arith.mulf %58, %62 : vector<2x8x8xf32>
    %64 = arith.truncf %63 : vector<2x8x8xf32> to vector<2x8x8xbf16>
    "tpu.trace_start"() <{level = 10 : i32, message = "bqk,bkd->bqd"}> : () -> ()
    %cst_24 = arith.constant dense<0.000000e+00> : vector<2x8x8xf32>
    %65 = tpu.matmul %64, %50, %cst_24 {dimension_numbers = #tpu.dot_dimension_numbers<[2], [1], [1], [2], [0, 0, 0, 1, 1, 2], [0], [0]>} : vector<2x8x8xbf16>, vector<2x8x8xbf16>, vector<2x8x8xf32> -> vector<2x8x8xf32>
    "tpu.trace_stop"() : () -> ()
    %66 = vector.extract_strided_slice %40 {offsets = [0, 0, 8], sizes = [2, 8, 8], strides = [1, 1, 1]} : vector<2x8x32xf32> to vector<2x8x8xf32>
    %67 = arith.truncf %66 : vector<2x8x8xf32> to vector<2x8x8xbf16>
    %68 = vector.extract_strided_slice %42 {offsets = [0, 0, 8], sizes = [2, 8, 8], strides = [1, 1, 1]} : vector<2x8x32xf32> to vector<2x8x8xf32>
    %69 = arith.truncf %68 : vector<2x8x8xf32> to vector<2x8x8xbf16>
    %70 = vector.extract_strided_slice %44 {offsets = [0, 0, 8], sizes = [2, 8, 8], strides = [1, 1, 1]} : vector<2x8x32xf32> to vector<2x8x8xf32>
    %71 = arith.truncf %70 : vector<2x8x8xf32> to vector<2x8x8xbf16>
    "tpu.trace_start"() <{level = 10 : i32, message = "bqd,bkd->bqk"}> : () -> ()
    %cst_25 = arith.constant dense<0.000000e+00> : vector<2x8x8xf32>
    %72 = tpu.matmul %67, %69, %cst_25 {dimension_numbers = #tpu.dot_dimension_numbers<[2], [2], [1], [1], [0, 0, 0, 1, 1, 1], [0], [0]>} : vector<2x8x8xbf16>, vector<2x8x8xbf16>, vector<2x8x8xf32> -> vector<2x8x8xf32>
    "tpu.trace_stop"() : () -> ()
    %73 = vector.broadcast %26 : vector<2x1x8xf32> to vector<2x8x8xf32>
    %74 = arith.addf %72, %73 : vector<2x8x8xf32>
    %cst_26 = arith.constant dense<0xFF800000> : vector<2x8xf32>
    %75 = vector.multi_reduction <maximumf>, %74, %cst_26 [2] : vector<2x8x8xf32> to vector<2x8xf32>
    %76 = vector.shape_cast %75 : vector<2x8xf32> to vector<2x8x1xf32>
    %77 = vector.broadcast %76 : vector<2x8x1xf32> to vector<2x8x8xf32>
    %78 = arith.subf %74, %77 : vector<2x8x8xf32>
    %79 = math.exp %78 : vector<2x8x8xf32>
    %cst_27 = arith.constant dense<0.000000e+00> : vector<2x8xf32>
    %80 = vector.multi_reduction <add>, %79, %cst_27 [2] : vector<2x8x8xf32> to vector<2x8xf32>
    %81 = vector.shape_cast %80 : vector<2x8xf32> to vector<2x8x1xf32>
    %82 = tpu.reciprocal %81 {approx = true} : vector<2x8x1xf32> -> vector<2x8x1xf32>
    %83 = vector.broadcast %82 : vector<2x8x1xf32> to vector<2x8x8xf32>
    %84 = arith.mulf %79, %83 : vector<2x8x8xf32>
    %85 = arith.truncf %84 : vector<2x8x8xf32> to vector<2x8x8xbf16>
    "tpu.trace_start"() <{level = 10 : i32, message = "bqk,bkd->bqd"}> : () -> ()
    %cst_28 = arith.constant dense<0.000000e+00> : vector<2x8x8xf32>
    %86 = tpu.matmul %85, %71, %cst_28 {dimension_numbers = #tpu.dot_dimension_numbers<[2], [1], [1], [2], [0, 0, 0, 1, 1, 2], [0], [0]>} : vector<2x8x8xbf16>, vector<2x8x8xbf16>, vector<2x8x8xf32> -> vector<2x8x8xf32>
    "tpu.trace_stop"() : () -> ()
    %87 = vector.extract_strided_slice %40 {offsets = [0, 0, 16], sizes = [2, 8, 8], strides = [1, 1, 1]} : vector<2x8x32xf32> to vector<2x8x8xf32>
    %88 = arith.truncf %87 : vector<2x8x8xf32> to vector<2x8x8xbf16>
    %89 = vector.extract_strided_slice %42 {offsets = [0, 0, 16], sizes = [2, 8, 8], strides = [1, 1, 1]} : vector<2x8x32xf32> to vector<2x8x8xf32>
    %90 = arith.truncf %89 : vector<2x8x8xf32> to vector<2x8x8xbf16>
    %91 = vector.extract_strided_slice %44 {offsets = [0, 0, 16], sizes = [2, 8, 8], strides = [1, 1, 1]} : vector<2x8x32xf32> to vector<2x8x8xf32>
    %92 = arith.truncf %91 : vector<2x8x8xf32> to vector<2x8x8xbf16>
    "tpu.trace_start"() <{level = 10 : i32, message = "bqd,bkd->bqk"}> : () -> ()
    %cst_29 = arith.constant dense<0.000000e+00> : vector<2x8x8xf32>
    %93 = tpu.matmul %88, %90, %cst_29 {dimension_numbers = #tpu.dot_dimension_numbers<[2], [2], [1], [1], [0, 0, 0, 1, 1, 1], [0], [0]>} : vector<2x8x8xbf16>, vector<2x8x8xbf16>, vector<2x8x8xf32> -> vector<2x8x8xf32>
    "tpu.trace_stop"() : () -> ()
    %94 = vector.broadcast %26 : vector<2x1x8xf32> to vector<2x8x8xf32>
    %95 = arith.addf %93, %94 : vector<2x8x8xf32>
    %cst_30 = arith.constant dense<0xFF800000> : vector<2x8xf32>
    %96 = vector.multi_reduction <maximumf>, %95, %cst_30 [2] : vector<2x8x8xf32> to vector<2x8xf32>
    %97 = vector.shape_cast %96 : vector<2x8xf32> to vector<2x8x1xf32>
    %98 = vector.broadcast %97 : vector<2x8x1xf32> to vector<2x8x8xf32>
    %99 = arith.subf %95, %98 : vector<2x8x8xf32>
    %100 = math.exp %99 : vector<2x8x8xf32>
    %cst_31 = arith.constant dense<0.000000e+00> : vector<2x8xf32>
    %101 = vector.multi_reduction <add>, %100, %cst_31 [2] : vector<2x8x8xf32> to vector<2x8xf32>
    %102 = vector.shape_cast %101 : vector<2x8xf32> to vector<2x8x1xf32>
    %103 = tpu.reciprocal %102 {approx = true} : vector<2x8x1xf32> -> vector<2x8x1xf32>
    %104 = vector.broadcast %103 : vector<2x8x1xf32> to vector<2x8x8xf32>
    %105 = arith.mulf %100, %104 : vector<2x8x8xf32>
    %106 = arith.truncf %105 : vector<2x8x8xf32> to vector<2x8x8xbf16>
    "tpu.trace_start"() <{level = 10 : i32, message = "bqk,bkd->bqd"}> : () -> ()
    %cst_32 = arith.constant dense<0.000000e+00> : vector<2x8x8xf32>
    %107 = tpu.matmul %106, %92, %cst_32 {dimension_numbers = #tpu.dot_dimension_numbers<[2], [1], [1], [2], [0, 0, 0, 1, 1, 2], [0], [0]>} : vector<2x8x8xbf16>, vector<2x8x8xbf16>, vector<2x8x8xf32> -> vector<2x8x8xf32>
    "tpu.trace_stop"() : () -> ()
    %108 = vector.extract_strided_slice %40 {offsets = [0, 0, 24], sizes = [2, 8, 8], strides = [1, 1, 1]} : vector<2x8x32xf32> to vector<2x8x8xf32>
    %109 = arith.truncf %108 : vector<2x8x8xf32> to vector<2x8x8xbf16>
    %110 = vector.extract_strided_slice %42 {offsets = [0, 0, 24], sizes = [2, 8, 8], strides = [1, 1, 1]} : vector<2x8x32xf32> to vector<2x8x8xf32>
    %111 = arith.truncf %110 : vector<2x8x8xf32> to vector<2x8x8xbf16>
    %112 = vector.extract_strided_slice %44 {offsets = [0, 0, 24], sizes = [2, 8, 8], strides = [1, 1, 1]} : vector<2x8x32xf32> to vector<2x8x8xf32>
    %113 = arith.truncf %112 : vector<2x8x8xf32> to vector<2x8x8xbf16>
    "tpu.trace_start"() <{level = 10 : i32, message = "bqd,bkd->bqk"}> : () -> ()
    %cst_33 = arith.constant dense<0.000000e+00> : vector<2x8x8xf32>
    %114 = tpu.matmul %109, %111, %cst_33 {dimension_numbers = #tpu.dot_dimension_numbers<[2], [2], [1], [1], [0, 0, 0, 1, 1, 1], [0], [0]>} : vector<2x8x8xbf16>, vector<2x8x8xbf16>, vector<2x8x8xf32> -> vector<2x8x8xf32>
    "tpu.trace_stop"() : () -> ()
    %115 = vector.broadcast %26 : vector<2x1x8xf32> to vector<2x8x8xf32>
    %116 = arith.addf %114, %115 : vector<2x8x8xf32>
    %cst_34 = arith.constant dense<0xFF800000> : vector<2x8xf32>
    %117 = vector.multi_reduction <maximumf>, %116, %cst_34 [2] : vector<2x8x8xf32> to vector<2x8xf32>
    %118 = vector.shape_cast %117 : vector<2x8xf32> to vector<2x8x1xf32>
    %119 = vector.broadcast %118 : vector<2x8x1xf32> to vector<2x8x8xf32>
    %120 = arith.subf %116, %119 : vector<2x8x8xf32>
    %121 = math.exp %120 : vector<2x8x8xf32>
    %cst_35 = arith.constant dense<0.000000e+00> : vector<2x8xf32>
    %122 = vector.multi_reduction <add>, %121, %cst_35 [2] : vector<2x8x8xf32> to vector<2x8xf32>
    %123 = vector.shape_cast %122 : vector<2x8xf32> to vector<2x8x1xf32>
    %124 = tpu.reciprocal %123 {approx = true} : vector<2x8x1xf32> -> vector<2x8x1xf32>
    %125 = vector.broadcast %124 : vector<2x8x1xf32> to vector<2x8x8xf32>
    %126 = arith.mulf %121, %125 : vector<2x8x8xf32>
    %127 = arith.truncf %126 : vector<2x8x8xf32> to vector<2x8x8xbf16>
    "tpu.trace_start"() <{level = 10 : i32, message = "bqk,bkd->bqd"}> : () -> ()
    %cst_36 = arith.constant dense<0.000000e+00> : vector<2x8x8xf32>
    %128 = tpu.matmul %127, %113, %cst_36 {dimension_numbers = #tpu.dot_dimension_numbers<[2], [1], [1], [2], [0, 0, 0, 1, 1, 2], [0], [0]>} : vector<2x8x8xbf16>, vector<2x8x8xbf16>, vector<2x8x8xf32> -> vector<2x8x8xf32>
    "tpu.trace_stop"() : () -> ()
    %129 = tpu.concatenate %65, %86, %107, %128 in 2 : vector<2x8x8xf32>, vector<2x8x8xf32>, vector<2x8x8xf32>, vector<2x8x8xf32> -> vector<2x8x32xf32>
    %130 = vector.shape_cast %129 : vector<2x8x32xf32> to vector<16x32xf32>
    %131 = arith.truncf %130 : vector<16x32xf32> to vector<16x32xbf16>
    %c0_37 = arith.constant 0 : index
    %c0_38 = arith.constant 0 : index
    %c0_39 = arith.constant 0 : index
    %132 = vector.load %arg5[%c0_37, %c0_38, %c0_39] : memref<2x32x32xbf16, #tpu.memory_space<vmem>>, vector<1x32x32xbf16>
    %133 = vector.shape_cast %132 : vector<1x32x32xbf16> to vector<32x32xbf16>
    %cst_40 = arith.constant dense<0.000000e+00> : vector<16x32xf32>
    %134 = tpu.matmul %131, %133, %cst_40 {dimension_numbers = #tpu.dot_dimension_numbers<[1], [0], [0], [1], [0, 0, 1, 1], [], []>} : vector<16x32xbf16>, vector<32x32xbf16>, vector<16x32xf32> -> vector<16x32xf32>
    %135 = vector.extract_strided_slice %28 {offsets = [0, 0], sizes = [1, 32], strides = [1, 1]} : vector<6x32xf32> to vector<1x32xf32>
    %136 = vector.broadcast %135 : vector<1x32xf32> to vector<16x32xf32>
    %137 = arith.addf %134, %136 : vector<16x32xf32>
    %138 = arith.addf %137, %25 : vector<16x32xf32>
    %139 = vector.extract_strided_slice %28 {offsets = [1, 0], sizes = [1, 32], strides = [1, 1]} : vector<6x32xf32> to vector<1x32xf32>
    %140 = vector.extract_strided_slice %28 {offsets = [2, 0], sizes = [1, 32], strides = [1, 1]} : vector<6x32xf32> to vector<1x32xf32>
    %cst_41 = arith.constant dense<0.000000e+00> : vector<16xf32>
    %141 = vector.multi_reduction <add>, %138, %cst_41 [1] : vector<16x32xf32> to vector<16xf32>
    %142 = vector.shape_cast %141 : vector<16xf32> to vector<16x1xf32>
    %cst_42 = arith.constant 3.200000e+01 : f32
    %143 = vector.broadcast %cst_42 : f32 to vector<16x1xf32>
    %144 = arith.divf %142, %143 : vector<16x1xf32>
    %145 = vector.broadcast %144 : vector<16x1xf32> to vector<16x32xf32>
    %146 = arith.subf %138, %145 : vector<16x32xf32>
    %147 = arith.mulf %146, %146 : vector<16x32xf32>
    %cst_43 = arith.constant dense<0.000000e+00> : vector<16xf32>
    %148 = vector.multi_reduction <add>, %147, %cst_43 [1] : vector<16x32xf32> to vector<16xf32>
    %149 = vector.shape_cast %148 : vector<16xf32> to vector<16x1xf32>
    %cst_44 = arith.constant 3.200000e+01 : f32
    %150 = vector.broadcast %cst_44 : f32 to vector<16x1xf32>
    %151 = arith.divf %149, %150 : vector<16x1xf32>
    %152 = vector.broadcast %144 : vector<16x1xf32> to vector<16x32xf32>
    %153 = arith.subf %138, %152 : vector<16x32xf32>
    %cst_45 = arith.constant 9.99999996E-13 : f32
    %154 = vector.broadcast %cst_45 : f32 to vector<16x1xf32>
    %155 = arith.addf %151, %154 : vector<16x1xf32>
    %156 = math.rsqrt %155 : vector<16x1xf32>
    %157 = vector.broadcast %156 : vector<16x1xf32> to vector<16x32xf32>
    %158 = arith.mulf %153, %157 : vector<16x32xf32>
    %159 = vector.broadcast %139 : vector<1x32xf32> to vector<16x32xf32>
    %160 = arith.mulf %158, %159 : vector<16x32xf32>
    %161 = vector.broadcast %140 : vector<1x32xf32> to vector<16x32xf32>
    %162 = arith.addf %160, %161 : vector<16x32xf32>
    %163 = arith.truncf %162 : vector<16x32xf32> to vector<16x32xbf16>
    %c0_46 = arith.constant 0 : index
    %c0_47 = arith.constant 0 : index
    %c0_48 = arith.constant 0 : index
    %164 = vector.load %arg6[%c0_46, %c0_47, %c0_48] : memref<2x32x64xbf16, #tpu.memory_space<vmem>>, vector<1x32x64xbf16>
    %165 = vector.shape_cast %164 : vector<1x32x64xbf16> to vector<32x64xbf16>
    %cst_49 = arith.constant dense<0.000000e+00> : vector<16x64xf32>
    %166 = tpu.matmul %163, %165, %cst_49 {dimension_numbers = #tpu.dot_dimension_numbers<[1], [0], [0], [1], [0, 0, 1, 1], [], []>} : vector<16x32xbf16>, vector<32x64xbf16>, vector<16x64xf32> -> vector<16x64xf32>
    %c0_50 = arith.constant 0 : index
    %c0_51 = arith.constant 0 : index
    %c0_52 = arith.constant 0 : index
    %167 = vector.load %arg7[%c0_50, %c0_51, %c0_52] : memref<2x1x64xf32, #tpu.memory_space<vmem>>, vector<1x1x64xf32>
    %168 = vector.shape_cast %167 : vector<1x1x64xf32> to vector<1x64xf32>
    %169 = vector.broadcast %168 : vector<1x64xf32> to vector<16x64xf32>
    %170 = arith.addf %166, %169 : vector<16x64xf32>
    %cst_53 = arith.constant 5.000000e-01 : f32
    %171 = vector.broadcast %cst_53 : f32 to vector<16x64xf32>
    %172 = arith.mulf %171, %170 : vector<16x64xf32>
    %cst_54 = arith.constant 4.471500e-02 : f32
    %173 = vector.broadcast %cst_54 : f32 to vector<16x64xf32>
    %174 = arith.mulf %173, %170 : vector<16x64xf32>
    %175 = arith.mulf %174, %170 : vector<16x64xf32>
    %176 = arith.mulf %175, %170 : vector<16x64xf32>
    %177 = arith.addf %170, %176 : vector<16x64xf32>
    %cst_55 = arith.constant 0.797884583 : f32
    %178 = vector.broadcast %cst_55 : f32 to vector<16x64xf32>
    %179 = arith.mulf %178, %177 : vector<16x64xf32>
    %180 = math.tanh %179 : vector<16x64xf32>
    %cst_56 = arith.constant 1.000000e+00 : f32
    %181 = vector.broadcast %cst_56 : f32 to vector<16x64xf32>
    %182 = arith.addf %181, %180 : vector<16x64xf32>
    %183 = arith.mulf %172, %182 : vector<16x64xf32>
    %184 = arith.truncf %183 : vector<16x64xf32> to vector<16x64xbf16>
    %c0_57 = arith.constant 0 : index
    %c0_58 = arith.constant 0 : index
    %c0_59 = arith.constant 0 : index
    %185 = vector.load %arg8[%c0_57, %c0_58, %c0_59] : memref<2x64x32xbf16, #tpu.memory_space<vmem>>, vector<1x64x32xbf16>
    %186 = vector.shape_cast %185 : vector<1x64x32xbf16> to vector<64x32xbf16>
    %cst_60 = arith.constant dense<0.000000e+00> : vector<16x32xf32>
    %187 = tpu.matmul %184, %186, %cst_60 {dimension_numbers = #tpu.dot_dimension_numbers<[1], [0], [0], [1], [0, 0, 1, 1], [], []>} : vector<16x64xbf16>, vector<64x32xbf16>, vector<16x32xf32> -> vector<16x32xf32>
    %188 = vector.extract_strided_slice %28 {offsets = [3, 0], sizes = [1, 32], strides = [1, 1]} : vector<6x32xf32> to vector<1x32xf32>
    %189 = vector.broadcast %188 : vector<1x32xf32> to vector<16x32xf32>
    %190 = arith.addf %187, %189 : vector<16x32xf32>
    %191 = arith.addf %190, %162 : vector<16x32xf32>
    %192 = vector.extract_strided_slice %28 {offsets = [4, 0], sizes = [1, 32], strides = [1, 1]} : vector<6x32xf32> to vector<1x32xf32>
    %193 = vector.extract_strided_slice %28 {offsets = [5, 0], sizes = [1, 32], strides = [1, 1]} : vector<6x32xf32> to vector<1x32xf32>
    %cst_61 = arith.constant dense<0.000000e+00> : vector<16xf32>
    %194 = vector.multi_reduction <add>, %191, %cst_61 [1] : vector<16x32xf32> to vector<16xf32>
    %195 = vector.shape_cast %194 : vector<16xf32> to vector<16x1xf32>
    %cst_62 = arith.constant 3.200000e+01 : f32
    %196 = vector.broadcast %cst_62 : f32 to vector<16x1xf32>
    %197 = arith.divf %195, %196 : vector<16x1xf32>
    %198 = vector.broadcast %197 : vector<16x1xf32> to vector<16x32xf32>
    %199 = arith.subf %191, %198 : vector<16x32xf32>
    %200 = arith.mulf %199, %199 : vector<16x32xf32>
    %cst_63 = arith.constant dense<0.000000e+00> : vector<16xf32>
    %201 = vector.multi_reduction <add>, %200, %cst_63 [1] : vector<16x32xf32> to vector<16xf32>
    %202 = vector.shape_cast %201 : vector<16xf32> to vector<16x1xf32>
    %cst_64 = arith.constant 3.200000e+01 : f32
    %203 = vector.broadcast %cst_64 : f32 to vector<16x1xf32>
    %204 = arith.divf %202, %203 : vector<16x1xf32>
    %205 = vector.broadcast %197 : vector<16x1xf32> to vector<16x32xf32>
    %206 = arith.subf %191, %205 : vector<16x32xf32>
    %cst_65 = arith.constant 9.99999996E-13 : f32
    %207 = vector.broadcast %cst_65 : f32 to vector<16x1xf32>
    %208 = arith.addf %204, %207 : vector<16x1xf32>
    %209 = math.rsqrt %208 : vector<16x1xf32>
    %210 = vector.broadcast %209 : vector<16x1xf32> to vector<16x32xf32>
    %211 = arith.mulf %206, %210 : vector<16x32xf32>
    %212 = vector.broadcast %192 : vector<1x32xf32> to vector<16x32xf32>
    %213 = arith.mulf %211, %212 : vector<16x32xf32>
    %214 = vector.broadcast %193 : vector<1x32xf32> to vector<16x32xf32>
    %215 = arith.addf %213, %214 : vector<16x32xf32>
    %c1 = arith.constant 1 : index
    %c0_66 = arith.constant 0 : index
    %c0_67 = arith.constant 0 : index
    %216 = vector.load %arg9[%c1, %c0_66, %c0_67] : memref<2x6x32xf32, #tpu.memory_space<vmem>>, vector<1x6x32xf32>
    %217 = vector.shape_cast %216 : vector<1x6x32xf32> to vector<6x32xf32>
    %218 = arith.truncf %215 : vector<16x32xf32> to vector<16x32xbf16>
    %c1_68 = arith.constant 1 : index
    %c0_69 = arith.constant 0 : index
    %c0_70 = arith.constant 0 : index
    %219 = vector.load %arg3[%c1_68, %c0_69, %c0_70] : memref<2x32x96xbf16, #tpu.memory_space<vmem>>, vector<1x32x96xbf16>
    %220 = vector.shape_cast %219 : vector<1x32x96xbf16> to vector<32x96xbf16>
    %cst_71 = arith.constant dense<0.000000e+00> : vector<16x96xf32>
    %221 = tpu.matmul %218, %220, %cst_71 {dimension_numbers = #tpu.dot_dimension_numbers<[1], [0], [0], [1], [0, 0, 1, 1], [], []>} : vector<16x32xbf16>, vector<32x96xbf16>, vector<16x96xf32> -> vector<16x96xf32>
    %c1_72 = arith.constant 1 : index
    %c0_73 = arith.constant 0 : index
    %c0_74 = arith.constant 0 : index
    %222 = vector.load %arg4[%c1_72, %c0_73, %c0_74] : memref<2x1x96xf32, #tpu.memory_space<vmem>>, vector<1x1x96xf32>
    %223 = vector.shape_cast %222 : vector<1x1x96xf32> to vector<1x96xf32>
    %224 = vector.broadcast %223 : vector<1x96xf32> to vector<16x96xf32>
    %225 = arith.addf %221, %224 : vector<16x96xf32>
    %226 = vector.extract_strided_slice %225 {offsets = [0, 0], sizes = [16, 32], strides = [1, 1]} : vector<16x96xf32> to vector<16x32xf32>
    %cst_75 = arith.constant 0.353553385 : f32
    %227 = vector.broadcast %cst_75 : f32 to vector<16x32xf32>
    %228 = arith.mulf %226, %227 : vector<16x32xf32>
    %229 = vector.shape_cast %228 : vector<16x32xf32> to vector<2x8x32xf32>
    %230 = vector.extract_strided_slice %225 {offsets = [0, 32], sizes = [16, 32], strides = [1, 1]} : vector<16x96xf32> to vector<16x32xf32>
    %231 = vector.shape_cast %230 : vector<16x32xf32> to vector<2x8x32xf32>
    %232 = vector.extract_strided_slice %225 {offsets = [0, 64], sizes = [16, 32], strides = [1, 1]} : vector<16x96xf32> to vector<16x32xf32>
    %233 = vector.shape_cast %232 : vector<16x32xf32> to vector<2x8x32xf32>
    %234 = vector.extract_strided_slice %229 {offsets = [0, 0, 0], sizes = [2, 8, 8], strides = [1, 1, 1]} : vector<2x8x32xf32> to vector<2x8x8xf32>
    %235 = arith.truncf %234 : vector<2x8x8xf32> to vector<2x8x8xbf16>
    %236 = vector.extract_strided_slice %231 {offsets = [0, 0, 0], sizes = [2, 8, 8], strides = [1, 1, 1]} : vector<2x8x32xf32> to vector<2x8x8xf32>
    %237 = arith.truncf %236 : vector<2x8x8xf32> to vector<2x8x8xbf16>
    %238 = vector.extract_strided_slice %233 {offsets = [0, 0, 0], sizes = [2, 8, 8], strides = [1, 1, 1]} : vector<2x8x32xf32> to vector<2x8x8xf32>
    %239 = arith.truncf %238 : vector<2x8x8xf32> to vector<2x8x8xbf16>
    "tpu.trace_start"() <{level = 10 : i32, message = "bqd,bkd->bqk"}> : () -> ()
    %cst_76 = arith.constant dense<0.000000e+00> : vector<2x8x8xf32>
    %240 = tpu.matmul %235, %237, %cst_76 {dimension_numbers = #tpu.dot_dimension_numbers<[2], [2], [1], [1], [0, 0, 0, 1, 1, 1], [0], [0]>} : vector<2x8x8xbf16>, vector<2x8x8xbf16>, vector<2x8x8xf32> -> vector<2x8x8xf32>
    "tpu.trace_stop"() : () -> ()
    %241 = vector.broadcast %26 : vector<2x1x8xf32> to vector<2x8x8xf32>
    %242 = arith.addf %240, %241 : vector<2x8x8xf32>
    %cst_77 = arith.constant dense<0xFF800000> : vector<2x8xf32>
    %243 = vector.multi_reduction <maximumf>, %242, %cst_77 [2] : vector<2x8x8xf32> to vector<2x8xf32>
    %244 = vector.shape_cast %243 : vector<2x8xf32> to vector<2x8x1xf32>
    %245 = vector.broadcast %244 : vector<2x8x1xf32> to vector<2x8x8xf32>
    %246 = arith.subf %242, %245 : vector<2x8x8xf32>
    %247 = math.exp %246 : vector<2x8x8xf32>
    %cst_78 = arith.constant dense<0.000000e+00> : vector<2x8xf32>
    %248 = vector.multi_reduction <add>, %247, %cst_78 [2] : vector<2x8x8xf32> to vector<2x8xf32>
    %249 = vector.shape_cast %248 : vector<2x8xf32> to vector<2x8x1xf32>
    %250 = tpu.reciprocal %249 {approx = true} : vector<2x8x1xf32> -> vector<2x8x1xf32>
    %251 = vector.broadcast %250 : vector<2x8x1xf32> to vector<2x8x8xf32>
    %252 = arith.mulf %247, %251 : vector<2x8x8xf32>
    %253 = arith.truncf %252 : vector<2x8x8xf32> to vector<2x8x8xbf16>
    "tpu.trace_start"() <{level = 10 : i32, message = "bqk,bkd->bqd"}> : () -> ()
    %cst_79 = arith.constant dense<0.000000e+00> : vector<2x8x8xf32>
    %254 = tpu.matmul %253, %239, %cst_79 {dimension_numbers = #tpu.dot_dimension_numbers<[2], [1], [1], [2], [0, 0, 0, 1, 1, 2], [0], [0]>} : vector<2x8x8xbf16>, vector<2x8x8xbf16>, vector<2x8x8xf32> -> vector<2x8x8xf32>
    "tpu.trace_stop"() : () -> ()
    %255 = vector.extract_strided_slice %229 {offsets = [0, 0, 8], sizes = [2, 8, 8], strides = [1, 1, 1]} : vector<2x8x32xf32> to vector<2x8x8xf32>
    %256 = arith.truncf %255 : vector<2x8x8xf32> to vector<2x8x8xbf16>
    %257 = vector.extract_strided_slice %231 {offsets = [0, 0, 8], sizes = [2, 8, 8], strides = [1, 1, 1]} : vector<2x8x32xf32> to vector<2x8x8xf32>
    %258 = arith.truncf %257 : vector<2x8x8xf32> to vector<2x8x8xbf16>
    %259 = vector.extract_strided_slice %233 {offsets = [0, 0, 8], sizes = [2, 8, 8], strides = [1, 1, 1]} : vector<2x8x32xf32> to vector<2x8x8xf32>
    %260 = arith.truncf %259 : vector<2x8x8xf32> to vector<2x8x8xbf16>
    "tpu.trace_start"() <{level = 10 : i32, message = "bqd,bkd->bqk"}> : () -> ()
    %cst_80 = arith.constant dense<0.000000e+00> : vector<2x8x8xf32>
    %261 = tpu.matmul %256, %258, %cst_80 {dimension_numbers = #tpu.dot_dimension_numbers<[2], [2], [1], [1], [0, 0, 0, 1, 1, 1], [0], [0]>} : vector<2x8x8xbf16>, vector<2x8x8xbf16>, vector<2x8x8xf32> -> vector<2x8x8xf32>
    "tpu.trace_stop"() : () -> ()
    %262 = vector.broadcast %26 : vector<2x1x8xf32> to vector<2x8x8xf32>
    %263 = arith.addf %261, %262 : vector<2x8x8xf32>
    %cst_81 = arith.constant dense<0xFF800000> : vector<2x8xf32>
    %264 = vector.multi_reduction <maximumf>, %263, %cst_81 [2] : vector<2x8x8xf32> to vector<2x8xf32>
    %265 = vector.shape_cast %264 : vector<2x8xf32> to vector<2x8x1xf32>
    %266 = vector.broadcast %265 : vector<2x8x1xf32> to vector<2x8x8xf32>
    %267 = arith.subf %263, %266 : vector<2x8x8xf32>
    %268 = math.exp %267 : vector<2x8x8xf32>
    %cst_82 = arith.constant dense<0.000000e+00> : vector<2x8xf32>
    %269 = vector.multi_reduction <add>, %268, %cst_82 [2] : vector<2x8x8xf32> to vector<2x8xf32>
    %270 = vector.shape_cast %269 : vector<2x8xf32> to vector<2x8x1xf32>
    %271 = tpu.reciprocal %270 {approx = true} : vector<2x8x1xf32> -> vector<2x8x1xf32>
    %272 = vector.broadcast %271 : vector<2x8x1xf32> to vector<2x8x8xf32>
    %273 = arith.mulf %268, %272 : vector<2x8x8xf32>
    %274 = arith.truncf %273 : vector<2x8x8xf32> to vector<2x8x8xbf16>
    "tpu.trace_start"() <{level = 10 : i32, message = "bqk,bkd->bqd"}> : () -> ()
    %cst_83 = arith.constant dense<0.000000e+00> : vector<2x8x8xf32>
    %275 = tpu.matmul %274, %260, %cst_83 {dimension_numbers = #tpu.dot_dimension_numbers<[2], [1], [1], [2], [0, 0, 0, 1, 1, 2], [0], [0]>} : vector<2x8x8xbf16>, vector<2x8x8xbf16>, vector<2x8x8xf32> -> vector<2x8x8xf32>
    "tpu.trace_stop"() : () -> ()
    %276 = vector.extract_strided_slice %229 {offsets = [0, 0, 16], sizes = [2, 8, 8], strides = [1, 1, 1]} : vector<2x8x32xf32> to vector<2x8x8xf32>
    %277 = arith.truncf %276 : vector<2x8x8xf32> to vector<2x8x8xbf16>
    %278 = vector.extract_strided_slice %231 {offsets = [0, 0, 16], sizes = [2, 8, 8], strides = [1, 1, 1]} : vector<2x8x32xf32> to vector<2x8x8xf32>
    %279 = arith.truncf %278 : vector<2x8x8xf32> to vector<2x8x8xbf16>
    %280 = vector.extract_strided_slice %233 {offsets = [0, 0, 16], sizes = [2, 8, 8], strides = [1, 1, 1]} : vector<2x8x32xf32> to vector<2x8x8xf32>
    %281 = arith.truncf %280 : vector<2x8x8xf32> to vector<2x8x8xbf16>
    "tpu.trace_start"() <{level = 10 : i32, message = "bqd,bkd->bqk"}> : () -> ()
    %cst_84 = arith.constant dense<0.000000e+00> : vector<2x8x8xf32>
    %282 = tpu.matmul %277, %279, %cst_84 {dimension_numbers = #tpu.dot_dimension_numbers<[2], [2], [1], [1], [0, 0, 0, 1, 1, 1], [0], [0]>} : vector<2x8x8xbf16>, vector<2x8x8xbf16>, vector<2x8x8xf32> -> vector<2x8x8xf32>
    "tpu.trace_stop"() : () -> ()
    %283 = vector.broadcast %26 : vector<2x1x8xf32> to vector<2x8x8xf32>
    %284 = arith.addf %282, %283 : vector<2x8x8xf32>
    %cst_85 = arith.constant dense<0xFF800000> : vector<2x8xf32>
    %285 = vector.multi_reduction <maximumf>, %284, %cst_85 [2] : vector<2x8x8xf32> to vector<2x8xf32>
    %286 = vector.shape_cast %285 : vector<2x8xf32> to vector<2x8x1xf32>
    %287 = vector.broadcast %286 : vector<2x8x1xf32> to vector<2x8x8xf32>
    %288 = arith.subf %284, %287 : vector<2x8x8xf32>
    %289 = math.exp %288 : vector<2x8x8xf32>
    %cst_86 = arith.constant dense<0.000000e+00> : vector<2x8xf32>
    %290 = vector.multi_reduction <add>, %289, %cst_86 [2] : vector<2x8x8xf32> to vector<2x8xf32>
    %291 = vector.shape_cast %290 : vector<2x8xf32> to vector<2x8x1xf32>
    %292 = tpu.reciprocal %291 {approx = true} : vector<2x8x1xf32> -> vector<2x8x1xf32>
    %293 = vector.broadcast %292 : vector<2x8x1xf32> to vector<2x8x8xf32>
    %294 = arith.mulf %289, %293 : vector<2x8x8xf32>
    %295 = arith.truncf %294 : vector<2x8x8xf32> to vector<2x8x8xbf16>
    "tpu.trace_start"() <{level = 10 : i32, message = "bqk,bkd->bqd"}> : () -> ()
    %cst_87 = arith.constant dense<0.000000e+00> : vector<2x8x8xf32>
    %296 = tpu.matmul %295, %281, %cst_87 {dimension_numbers = #tpu.dot_dimension_numbers<[2], [1], [1], [2], [0, 0, 0, 1, 1, 2], [0], [0]>} : vector<2x8x8xbf16>, vector<2x8x8xbf16>, vector<2x8x8xf32> -> vector<2x8x8xf32>
    "tpu.trace_stop"() : () -> ()
    %297 = vector.extract_strided_slice %229 {offsets = [0, 0, 24], sizes = [2, 8, 8], strides = [1, 1, 1]} : vector<2x8x32xf32> to vector<2x8x8xf32>
    %298 = arith.truncf %297 : vector<2x8x8xf32> to vector<2x8x8xbf16>
    %299 = vector.extract_strided_slice %231 {offsets = [0, 0, 24], sizes = [2, 8, 8], strides = [1, 1, 1]} : vector<2x8x32xf32> to vector<2x8x8xf32>
    %300 = arith.truncf %299 : vector<2x8x8xf32> to vector<2x8x8xbf16>
    %301 = vector.extract_strided_slice %233 {offsets = [0, 0, 24], sizes = [2, 8, 8], strides = [1, 1, 1]} : vector<2x8x32xf32> to vector<2x8x8xf32>
    %302 = arith.truncf %301 : vector<2x8x8xf32> to vector<2x8x8xbf16>
    "tpu.trace_start"() <{level = 10 : i32, message = "bqd,bkd->bqk"}> : () -> ()
    %cst_88 = arith.constant dense<0.000000e+00> : vector<2x8x8xf32>
    %303 = tpu.matmul %298, %300, %cst_88 {dimension_numbers = #tpu.dot_dimension_numbers<[2], [2], [1], [1], [0, 0, 0, 1, 1, 1], [0], [0]>} : vector<2x8x8xbf16>, vector<2x8x8xbf16>, vector<2x8x8xf32> -> vector<2x8x8xf32>
    "tpu.trace_stop"() : () -> ()
    %304 = vector.broadcast %26 : vector<2x1x8xf32> to vector<2x8x8xf32>
    %305 = arith.addf %303, %304 : vector<2x8x8xf32>
    %cst_89 = arith.constant dense<0xFF800000> : vector<2x8xf32>
    %306 = vector.multi_reduction <maximumf>, %305, %cst_89 [2] : vector<2x8x8xf32> to vector<2x8xf32>
    %307 = vector.shape_cast %306 : vector<2x8xf32> to vector<2x8x1xf32>
    %308 = vector.broadcast %307 : vector<2x8x1xf32> to vector<2x8x8xf32>
    %309 = arith.subf %305, %308 : vector<2x8x8xf32>
    %310 = math.exp %309 : vector<2x8x8xf32>
    %cst_90 = arith.constant dense<0.000000e+00> : vector<2x8xf32>
    %311 = vector.multi_reduction <add>, %310, %cst_90 [2] : vector<2x8x8xf32> to vector<2x8xf32>
    %312 = vector.shape_cast %311 : vector<2x8xf32> to vector<2x8x1xf32>
    %313 = tpu.reciprocal %312 {approx = true} : vector<2x8x1xf32> -> vector<2x8x1xf32>
    %314 = vector.broadcast %313 : vector<2x8x1xf32> to vector<2x8x8xf32>
    %315 = arith.mulf %310, %314 : vector<2x8x8xf32>
    %316 = arith.truncf %315 : vector<2x8x8xf32> to vector<2x8x8xbf16>
    "tpu.trace_start"() <{level = 10 : i32, message = "bqk,bkd->bqd"}> : () -> ()
    %cst_91 = arith.constant dense<0.000000e+00> : vector<2x8x8xf32>
    %317 = tpu.matmul %316, %302, %cst_91 {dimension_numbers = #tpu.dot_dimension_numbers<[2], [1], [1], [2], [0, 0, 0, 1, 1, 2], [0], [0]>} : vector<2x8x8xbf16>, vector<2x8x8xbf16>, vector<2x8x8xf32> -> vector<2x8x8xf32>
    "tpu.trace_stop"() : () -> ()
    %318 = tpu.concatenate %254, %275, %296, %317 in 2 : vector<2x8x8xf32>, vector<2x8x8xf32>, vector<2x8x8xf32>, vector<2x8x8xf32> -> vector<2x8x32xf32>
    %319 = vector.shape_cast %318 : vector<2x8x32xf32> to vector<16x32xf32>
    %320 = arith.truncf %319 : vector<16x32xf32> to vector<16x32xbf16>
    %c1_92 = arith.constant 1 : index
    %c0_93 = arith.constant 0 : index
    %c0_94 = arith.constant 0 : index
    %321 = vector.load %arg5[%c1_92, %c0_93, %c0_94] : memref<2x32x32xbf16, #tpu.memory_space<vmem>>, vector<1x32x32xbf16>
    %322 = vector.shape_cast %321 : vector<1x32x32xbf16> to vector<32x32xbf16>
    %cst_95 = arith.constant dense<0.000000e+00> : vector<16x32xf32>
    %323 = tpu.matmul %320, %322, %cst_95 {dimension_numbers = #tpu.dot_dimension_numbers<[1], [0], [0], [1], [0, 0, 1, 1], [], []>} : vector<16x32xbf16>, vector<32x32xbf16>, vector<16x32xf32> -> vector<16x32xf32>
    %324 = vector.extract_strided_slice %217 {offsets = [0, 0], sizes = [1, 32], strides = [1, 1]} : vector<6x32xf32> to vector<1x32xf32>
    %325 = vector.broadcast %324 : vector<1x32xf32> to vector<16x32xf32>
    %326 = arith.addf %323, %325 : vector<16x32xf32>
    %327 = arith.addf %326, %215 : vector<16x32xf32>
    %328 = vector.extract_strided_slice %217 {offsets = [1, 0], sizes = [1, 32], strides = [1, 1]} : vector<6x32xf32> to vector<1x32xf32>
    %329 = vector.extract_strided_slice %217 {offsets = [2, 0], sizes = [1, 32], strides = [1, 1]} : vector<6x32xf32> to vector<1x32xf32>
    %cst_96 = arith.constant dense<0.000000e+00> : vector<16xf32>
    %330 = vector.multi_reduction <add>, %327, %cst_96 [1] : vector<16x32xf32> to vector<16xf32>
    %331 = vector.shape_cast %330 : vector<16xf32> to vector<16x1xf32>
    %cst_97 = arith.constant 3.200000e+01 : f32
    %332 = vector.broadcast %cst_97 : f32 to vector<16x1xf32>
    %333 = arith.divf %331, %332 : vector<16x1xf32>
    %334 = vector.broadcast %333 : vector<16x1xf32> to vector<16x32xf32>
    %335 = arith.subf %327, %334 : vector<16x32xf32>
    %336 = arith.mulf %335, %335 : vector<16x32xf32>
    %cst_98 = arith.constant dense<0.000000e+00> : vector<16xf32>
    %337 = vector.multi_reduction <add>, %336, %cst_98 [1] : vector<16x32xf32> to vector<16xf32>
    %338 = vector.shape_cast %337 : vector<16xf32> to vector<16x1xf32>
    %cst_99 = arith.constant 3.200000e+01 : f32
    %339 = vector.broadcast %cst_99 : f32 to vector<16x1xf32>
    %340 = arith.divf %338, %339 : vector<16x1xf32>
    %341 = vector.broadcast %333 : vector<16x1xf32> to vector<16x32xf32>
    %342 = arith.subf %327, %341 : vector<16x32xf32>
    %cst_100 = arith.constant 9.99999996E-13 : f32
    %343 = vector.broadcast %cst_100 : f32 to vector<16x1xf32>
    %344 = arith.addf %340, %343 : vector<16x1xf32>
    %345 = math.rsqrt %344 : vector<16x1xf32>
    %346 = vector.broadcast %345 : vector<16x1xf32> to vector<16x32xf32>
    %347 = arith.mulf %342, %346 : vector<16x32xf32>
    %348 = vector.broadcast %328 : vector<1x32xf32> to vector<16x32xf32>
    %349 = arith.mulf %347, %348 : vector<16x32xf32>
    %350 = vector.broadcast %329 : vector<1x32xf32> to vector<16x32xf32>
    %351 = arith.addf %349, %350 : vector<16x32xf32>
    %352 = arith.truncf %351 : vector<16x32xf32> to vector<16x32xbf16>
    %c1_101 = arith.constant 1 : index
    %c0_102 = arith.constant 0 : index
    %c0_103 = arith.constant 0 : index
    %353 = vector.load %arg6[%c1_101, %c0_102, %c0_103] : memref<2x32x64xbf16, #tpu.memory_space<vmem>>, vector<1x32x64xbf16>
    %354 = vector.shape_cast %353 : vector<1x32x64xbf16> to vector<32x64xbf16>
    %cst_104 = arith.constant dense<0.000000e+00> : vector<16x64xf32>
    %355 = tpu.matmul %352, %354, %cst_104 {dimension_numbers = #tpu.dot_dimension_numbers<[1], [0], [0], [1], [0, 0, 1, 1], [], []>} : vector<16x32xbf16>, vector<32x64xbf16>, vector<16x64xf32> -> vector<16x64xf32>
    %c1_105 = arith.constant 1 : index
    %c0_106 = arith.constant 0 : index
    %c0_107 = arith.constant 0 : index
    %356 = vector.load %arg7[%c1_105, %c0_106, %c0_107] : memref<2x1x64xf32, #tpu.memory_space<vmem>>, vector<1x1x64xf32>
    %357 = vector.shape_cast %356 : vector<1x1x64xf32> to vector<1x64xf32>
    %358 = vector.broadcast %357 : vector<1x64xf32> to vector<16x64xf32>
    %359 = arith.addf %355, %358 : vector<16x64xf32>
    %cst_108 = arith.constant 5.000000e-01 : f32
    %360 = vector.broadcast %cst_108 : f32 to vector<16x64xf32>
    %361 = arith.mulf %360, %359 : vector<16x64xf32>
    %cst_109 = arith.constant 4.471500e-02 : f32
    %362 = vector.broadcast %cst_109 : f32 to vector<16x64xf32>
    %363 = arith.mulf %362, %359 : vector<16x64xf32>
    %364 = arith.mulf %363, %359 : vector<16x64xf32>
    %365 = arith.mulf %364, %359 : vector<16x64xf32>
    %366 = arith.addf %359, %365 : vector<16x64xf32>
    %cst_110 = arith.constant 0.797884583 : f32
    %367 = vector.broadcast %cst_110 : f32 to vector<16x64xf32>
    %368 = arith.mulf %367, %366 : vector<16x64xf32>
    %369 = math.tanh %368 : vector<16x64xf32>
    %cst_111 = arith.constant 1.000000e+00 : f32
    %370 = vector.broadcast %cst_111 : f32 to vector<16x64xf32>
    %371 = arith.addf %370, %369 : vector<16x64xf32>
    %372 = arith.mulf %361, %371 : vector<16x64xf32>
    %373 = arith.truncf %372 : vector<16x64xf32> to vector<16x64xbf16>
    %c1_112 = arith.constant 1 : index
    %c0_113 = arith.constant 0 : index
    %c0_114 = arith.constant 0 : index
    %374 = vector.load %arg8[%c1_112, %c0_113, %c0_114] : memref<2x64x32xbf16, #tpu.memory_space<vmem>>, vector<1x64x32xbf16>
    %375 = vector.shape_cast %374 : vector<1x64x32xbf16> to vector<64x32xbf16>
    %cst_115 = arith.constant dense<0.000000e+00> : vector<16x32xf32>
    %376 = tpu.matmul %373, %375, %cst_115 {dimension_numbers = #tpu.dot_dimension_numbers<[1], [0], [0], [1], [0, 0, 1, 1], [], []>} : vector<16x64xbf16>, vector<64x32xbf16>, vector<16x32xf32> -> vector<16x32xf32>
    %377 = vector.extract_strided_slice %217 {offsets = [3, 0], sizes = [1, 32], strides = [1, 1]} : vector<6x32xf32> to vector<1x32xf32>
    %378 = vector.broadcast %377 : vector<1x32xf32> to vector<16x32xf32>
    %379 = arith.addf %376, %378 : vector<16x32xf32>
    %380 = arith.addf %379, %351 : vector<16x32xf32>
    %381 = vector.extract_strided_slice %217 {offsets = [4, 0], sizes = [1, 32], strides = [1, 1]} : vector<6x32xf32> to vector<1x32xf32>
    %382 = vector.extract_strided_slice %217 {offsets = [5, 0], sizes = [1, 32], strides = [1, 1]} : vector<6x32xf32> to vector<1x32xf32>
    %cst_116 = arith.constant dense<0.000000e+00> : vector<16xf32>
    %383 = vector.multi_reduction <add>, %380, %cst_116 [1] : vector<16x32xf32> to vector<16xf32>
    %384 = vector.shape_cast %383 : vector<16xf32> to vector<16x1xf32>
    %cst_117 = arith.constant 3.200000e+01 : f32
    %385 = vector.broadcast %cst_117 : f32 to vector<16x1xf32>
    %386 = arith.divf %384, %385 : vector<16x1xf32>
    %387 = vector.broadcast %386 : vector<16x1xf32> to vector<16x32xf32>
    %388 = arith.subf %380, %387 : vector<16x32xf32>
    %389 = arith.mulf %388, %388 : vector<16x32xf32>
    %cst_118 = arith.constant dense<0.000000e+00> : vector<16xf32>
    %390 = vector.multi_reduction <add>, %389, %cst_118 [1] : vector<16x32xf32> to vector<16xf32>
    %391 = vector.shape_cast %390 : vector<16xf32> to vector<16x1xf32>
    %cst_119 = arith.constant 3.200000e+01 : f32
    %392 = vector.broadcast %cst_119 : f32 to vector<16x1xf32>
    %393 = arith.divf %391, %392 : vector<16x1xf32>
    %394 = vector.broadcast %386 : vector<16x1xf32> to vector<16x32xf32>
    %395 = arith.subf %380, %394 : vector<16x32xf32>
    %cst_120 = arith.constant 9.99999996E-13 : f32
    %396 = vector.broadcast %cst_120 : f32 to vector<16x1xf32>
    %397 = arith.addf %393, %396 : vector<16x1xf32>
    %398 = math.rsqrt %397 : vector<16x1xf32>
    %399 = vector.broadcast %398 : vector<16x1xf32> to vector<16x32xf32>
    %400 = arith.mulf %395, %399 : vector<16x32xf32>
    %401 = vector.broadcast %381 : vector<1x32xf32> to vector<16x32xf32>
    %402 = arith.mulf %400, %401 : vector<16x32xf32>
    %403 = vector.broadcast %382 : vector<1x32xf32> to vector<16x32xf32>
    %404 = arith.addf %402, %403 : vector<16x32xf32>
    %405 = vector.extract_strided_slice %404 {offsets = [0, 0], sizes = [1, 32], strides = [1, 1]} : vector<16x32xf32> to vector<1x32xf32>
    %406 = vector.extract_strided_slice %404 {offsets = [8, 0], sizes = [1, 32], strides = [1, 1]} : vector<16x32xf32> to vector<1x32xf32>
    %407 = tpu.concatenate %405, %406 in 0 : vector<1x32xf32>, vector<1x32xf32> -> vector<2x32xf32>
    %408 = arith.truncf %407 : vector<2x32xf32> to vector<2x32xbf16>
    %c0_121 = arith.constant 0 : index
    %c0_122 = arith.constant 0 : index
    %409 = vector.load %arg10[%c0_121, %c0_122] : memref<32x128xbf16, #tpu.memory_space<vmem>>, vector<32x128xbf16>
    %cst_123 = arith.constant dense<0.000000e+00> : vector<2x128xf32>
    %410 = tpu.matmul %408, %409, %cst_123 {dimension_numbers = #tpu.dot_dimension_numbers<[1], [0], [0], [1], [0, 0, 1, 1], [], []>} : vector<2x32xbf16>, vector<32x128xbf16>, vector<2x128xf32> -> vector<2x128xf32>
    %c0_124 = arith.constant 0 : index
    %c0_125 = arith.constant 0 : index
    %411 = vector.load %arg11[%c0_124, %c0_125] : memref<1x128xf32, #tpu.memory_space<vmem>>, vector<1x128xf32>
    %412 = vector.broadcast %411 : vector<1x128xf32> to vector<2x128xf32>
    %413 = arith.addf %410, %412 : vector<2x128xf32>
    %c0_126 = arith.constant 0 : index
    %c0_127 = arith.constant 0 : index
    %414 = vector.load %arg12[%c0_126, %c0_127] : memref<2x128xf32, #tpu.memory_space<vmem>>, vector<2x128xf32>
    tpu.vector_store %arg12[%c0_126, %c0_127], %413 {strides = array<i32>} : memref<2x128xf32, #tpu.memory_space<vmem>>, vector<2x128xf32>,
    return
  }
}

</mosaic_0001>

<bundles_post_ra>
// kernel: bert_classifier_forward.1
= control target key start
LH: loop header
LB: loop body
LE: loop exit
PB: predicated region body
PF: predicated region fallthrough
CT: control target
= control target key end

     0   :  { %vm46_vm0 = vcmask 261120   ;;  %s2619_s0 = inlined_call_operand.vmem [shape: f32[16,32], index: 0, kind: input, shape index: {}]   ;;  %s2620_s1 = inlined_call_operand.vmem [shape: f32[2,1,8], index: 1, kind: input, shape index: {}]   ;;  %s2621_s2 = inlined_call_operand.vmem [shape: f32[2,32], index: 2, kind: input, shape index: {}]   ;;  %s2622_s3 = inlined_call_operand.vmem [shape: bf16[2,32,96], index: 3, kind: input, shape index: {}]   ;;  %s2623_s4 = inlined_call_operand.vmem [shape: f32[2,1,96], index: 4, kind: input, shape index: {}]   ;;  %s2624_s5 = inlined_call_operand.vmem [shape: bf16[2,32,32], index: 5, kind: input, shape index: {}]   ;;  %s2625_s6 = inlined_call_operand.vmem [shape: bf16[2,32,64], index: 6, kind: input, shape index: {}]   ;;  %s2626_s7 = inlined_call_operand.vmem [shape: f32[2,1,64], index: 7, kind: input, shape index: {}]   ;;  %s2627_s8 = inlined_call_operand.vmem [shape: bf16[2,64,32], index: 8, kind: input, shape index: {}]   ;;  %s2628_s9 = inlined_call_operand.vmem [shape: f32[2,6,32], index: 9, kind: input, shape index: {}]   ;;  %s2629_s10 = inlined_call_operand.vmem [shape: bf16[32,128], index: 10, kind: input, shape index: {}]   ;;  %s2630_s11 = inlined_call_operand.vmem [shape: f32[1,128], index: 11, kind: input, shape index: {}]   ;;  %s2631_s12 = inlined_call_operand.hbm [shape: f32[2,128], index: 12, kind: output, shape index: {}]  }
   0x1   :  { %v44_v0 = vld [vmem:[%s2619_s0] sm:$0xff] }
   0x2   :  { %v47_v1 = vsel %vm46_vm0, %v44_v0, 0.0 }
   0x3   :  { %48 = vadd.xlane.f32.xlu0 %v47_v1 }
   0x4   :  { %17 = vsyncpa [#allocation3], 0  ;;  %v45_v2 = vld [vmem:[%s2619_s0 + $0x8] sm:$0xff]  ;;  %v2084_v4 = vmov 32.0   ;;  %v1889_v23 = vld [vmem:[%s2622_s3] sm:$0xff]  ;;  %s2085_s13 = smov 88  }
   0x5   :  { %v50_v3 = vsel %vm46_vm0, %v45_v2, 0.0  ;;  %1964 = vrcp.f32 %v2084_v4  ;;  %v1890_v21 = vld [vmem:[%s2622_s3 + $0x8] sm:$0xff]  ;;  %v43_v40 = vld [vmem:[%s2621_s2] sm:$0x3]  ;;  %s2086_s14 = smov 96   ;;  %s2087_s15 = smov 80  }
   0x6   :  { %137 = vmatpush.bf16.msra.mxu0 %v1890_v21  ;;  %v98_v43 = vperm.slane %v43_v40, 0  ;;  %v101_v48 = vperm.slane %v43_v40, 1  ;;  %v1957_v53 = vld [vmem:[%s2623_s4] ss:$0 sm:$0xff]  ;;  %s2088_s16 = smov 112   ;;  %s2089_s17 = smov 72  }
   0x7   :  { %s2090_s18 = smov 120   ;;  %s2091_s19 = smov 104   ;;  %vm162_vm8 = vcmask 64512   ;;  %vm235_vm9 = vcmask 1043456   ;;  %vm641_vm10 = vcmask 130048   ;;  %vm644_vm11 = vcmask 195584  }
   0x8   :  { %s2092_s24 = smov 64   ;;  %s2094_s0 = smov 48  }
   0x9   :  { %s2095_s25 = smov 40   ;;  %s2634_s26 = smov 8  }
   0xa   :  { %138 = vmatpush.bf16.msra.mxu0 %v1889_v23  ;;  %s2633_s27 = smov 16   ;;  %s2632_s28 = smov 24  }
   0xb   :  { %51 = vadd.xlane.f32.xlu0 %v50_v3  ;;  %v1965_v5 = vpop.eup %1964 }
   0xc   :  { %v54_v6 = vmul.f32 32.0, %v1965_v5  ;;  %vm58_vm1 = vweird.f32 %v1965_v5 }
   0xe   :  { %v55_v7 = vsub.f32 1.0, %v54_v6 }
  0x10   :  { %v56_v8 = vmul.f32 %v1965_v5, %v55_v7 }
  0x12   :  { %v57_v9 = vadd.f32 %v1965_v5, %v56_v8 }
  0x14   :  { %v2173_v10 = vsel %vm58_vm1, %v1965_v5, %v57_v9 }
  0x76   :  { %v49_v11 = vpop.xlane.xlu0 %48 }
  0x77   :  { %v60_v12 = vmul.f32 %v2173_v10, %v49_v11 }
  0x79   :  { %v62_v13 = vsub.f32 %v44_v0, %v60_v12 }
  0x7b   :  { %v64_v14 = vmul.f32 %v62_v13, %v62_v13 }
  0x7d   :  { %v66_v15 = vsel %vm46_vm0, %v64_v14, 0.0 }
  0x7e   :  { %67 = vadd.xlane.f32.xlu1 %v66_v15  ;;  %v52_v16 = vpop.xlane.xlu0 %51 }
  0x7f   :  { %v61_v17 = vmul.f32 %v2173_v10, %v52_v16 }
  0x81   :  { %v63_v18 = vsub.f32 %v45_v2, %v61_v17 }
  0x83   :  { %v65_v19 = vmul.f32 %v63_v18, %v63_v18 }
  0x85   :  { %v69_v20 = vsel %vm46_vm0, %v65_v19, 0.0 }
  0x86   :  { %70 = vadd.xlane.f32.xlu1 %v69_v20 }
  0xf1   :  { %v68_v22 = vpop.xlane.xlu1 %67 }
  0xf2   :  { %v72_v24 = vmul.f32 %v68_v22, %v2173_v10 }
  0xf4   :  { %v74_v25 = vadd.f32 1e-12, %v72_v24 }
  0xf6   :  { %1966 = vrsqrt.f32 %v74_v25  ;;  %vm82_vm3 = vweird.f32 %v74_v25 }
  0xf9   :  { %v71_v26 = vpop.xlane.xlu1 %70 }
  0xfa   :  { %v73_v27 = vmul.f32 %v71_v26, %v2173_v10 }
  0xfc   :  { %v1967_v28 = vpop.eup %1966  ;;  %v75_v29 = vadd.f32 1e-12, %v73_v27 }
  0xfd   :  { %v77_v30 = vmul.f32 %v1967_v28, %v74_v25  ;;  %vm83_vm2 = vweird.f32 %v1967_v28 }
  0xfe   :  { %1968 = vrsqrt.f32 %v75_v29  ;;  %vm84_vm4 = vmor %vm82_vm3, %vm83_vm2  ;;  %vm92_vm6 = vweird.f32 %v75_v29  ;;  %vm824_vm3 = vcmask 523264  }
  0xff   :  { %v78_v31 = vmul.f32 %v1967_v28, %v77_v30 }
 0x101   :  { %v79_v32 = vmul.f32 0.5, %v78_v31  ;;  %v2245_v31 = vld [vmem:[%s2620_s1] ss:$0 sm:$0xff] }
 0x103   :  { %v80_v33 = vsub.f32 1.5, %v79_v32 }
 0x104   :  { %v1969_v34 = vpop.eup %1968 }
 0x105   :  { %v81_v35 = vmul.f32 %v1967_v28, %v80_v33  ;;  %v87_v36 = vmul.f32 %v1969_v34, %v75_v29  ;;  %vm93_vm5 = vweird.f32 %v1969_v34 }
 0x106   :  { %vm94_vm7 = vmor %vm92_vm6, %vm93_vm5 }
 0x107   :  { %v88_v37 = vmul.f32 %v1969_v34, %v87_v36  ;;  %v85_v38 = vsel %vm84_vm4, %v1967_v28, %v81_v35  ;;  %v2252_v36 = vld [vmem:[%s2620_s1 + $0x1] ss:$0 sm:$0xff]  ;;  %s2093_s1 = smov 56  }
 0x108   :  { %v96_v42 = vmul.f32 %v85_v38, %v62_v13 }
 0x109   :  { %v89_v39 = vmul.f32 0.5, %v88_v37 }
 0x10a   :  { %v99_v47 = vmul.f32 %v98_v43, %v96_v42 }
 0x10b   :  { %v90_v41 = vsub.f32 1.5, %v89_v39 }
 0x10c   :  { %v2190_v50 = vadd.f32 %v101_v48, %v99_v47 }
 0x10d   :  { %v91_v44 = vmul.f32 %v1969_v34, %v90_v41 }
 0x10f   :  { %v95_v45 = vsel %vm94_vm7, %v1969_v34, %v91_v44 }
 0x110   :  { %v97_v46 = vmul.f32 %v95_v45, %v63_v18 }
 0x112   :  { %v100_v49 = vmul.f32 %v98_v43, %v97_v46 }
 0x114   :  { %v2192_v51 = vadd.f32 %v101_v48, %v100_v49 }
 0x116   :  { %v107_v52 = vpack.c.bf16 %v2192_v51, %v2190_v50 }
 0x118   :  { %1745 = vmatmul.msk.bf16.vlgmr.msra.gmra.mxu0 %vm46_vm0, %v107_v52 }
 0x195   :  { %v140_v54 = vpop.f32.mrf.mxu0 }
 0x196   :  { %v141_v55 = vadd.f32 %v1957_v53, %v140_v54 }
 0x198   :  { %v149_v56 = vpack.c.bf16 %v141_v55, %v141_v55  ;;  %v145_v63 = vmul.f32 0.35355338, %v141_v55 }
 0x19a   :  { %v158_v57 = vunpack.c.l.b16 %v149_v56  ;;  %v147_v3 = vpack.c.bf16 %v145_v63, %v145_v63 }
 0x19c   :  { %v2200_v58 = vpack.c.b16 %v158_v57, %v158_v57  ;;  %v274_v5 = vunpack.c.l.b16 %v147_v3 }
 0x19d   :  { %v142_v59 = vpop.f32.mrf.mxu0 }
 0x19e   :  { %v143_v60 = vadd.f32 %v1957_v53, %v142_v59  ;;  %278 = vrot.lane.b32.xlu0 %v2200_v58, %s2085_s13  ;;  %160 = vrot.lane.b32.xlu2 %v2200_v58, %s2086_s14  ;;  %v275_v7 = vpack.c.b16 %v274_v5, %v274_v5 }
 0x1a0   :  { %v146_v61 = vmul.f32 0.35355338, %v143_v60  ;;  %v150_v62 = vpack.c.bf16 %v143_v60, %v143_v60 }
 0x1a2   :  { %v183_v0 = vunpack.c.l.b16 %v150_v62  ;;  %v148_v1 = vpack.c.bf16 %v146_v61, %v146_v61 }
 0x1a4   :  { %v2206_v2 = vpack.c.b16 %v183_v0, %v183_v0  ;;  %v300_v4 = vunpack.c.l.b16 %v148_v1 }
 0x1a6   :  { %304 = vrot.lane.b32.xlu1 %v2206_v2, %s2085_s13  ;;  %416 = vrot.lane.b32.xlu0 %v2206_v2, %s2087_s15  ;;  %v301_v6 = vpack.c.b16 %v300_v4, %v300_v4 }
 0x1a7   :  { %185 = vrot.lane.b32.xlu2 %v2206_v2, %s2086_s14 }
 0x1ae   :  { %414 = vrot.lane.b32.xlu1 %v301_v6, %s2088_s16  ;;  %505 = vrot.lane.b32.xlu0 %v2200_v58, %s2089_s17 }
 0x1af   :  { %276 = vrot.lane.b32.xlu2 %v275_v7, %s2090_s18 }
 0x1b6   :  { %526 = vrot.lane.b32.xlu0 %v301_v6, %s2091_s19  ;;  %503 = vrot.lane.b32.xlu1 %v275_v7, %s2091_s19 }
 0x1b7   :  { %302 = vrot.lane.b32.xlu2 %v301_v6, %s2090_s18 }
 0x1bf   :  { %393 = vrot.lane.b32.xlu2 %v2200_v58, %s2087_s15 }
 0x1c7   :  { %391 = vrot.lane.b32.xlu2 %v275_v7, %s2088_s16 }
 0x1cf   :  { %528 = vrot.lane.b32.xlu2 %v2206_v2, %s2089_s17 }
 0x1f8   :  { %v161_v8 = vpop.permute.xlu2 %160 }
 0x1f9   :  { %v167_v9 = vsel %vm162_vm8, %v161_v8, 0 }
 0x1fa   :  { %176 = vmatpush.bf16.xpose.msra.mxu1 %v167_v9 }
 0x201   :  { %v186_v11 = vpop.permute.xlu2 %185  ;;  %1746 = vmatmul.msk.bf16.vlgmr.msra.gmra.mxu1 %vm162_vm8, %v147_v3 }
 0x202   :  { %v191_v12 = vsel %vm162_vm8, %v186_v11, 0 }
 0x203   :  { %200 = vmatpush.bf16.xpose.msra.mxu2 %v191_v12 }
 0x209   :  { %v277_v13 = vpop.permute.xlu2 %276 }
 0x20a   :  { %1747 = vmatmul.msk.bf16.vlgmr.msra.gmra.mxu2 %vm162_vm8, %v148_v1 }
 0x210   :  { %v279_v14 = vpop.permute.xlu0 %278 }
 0x211   :  { %v303_v15 = vpop.permute.xlu2 %302  ;;  %v284_v16 = vsel %vm162_vm8, %v279_v14, 0 }
 0x212   :  { %293 = vmatpush.bf16.xpose.msrb.mxu0 %v284_v16 }
 0x218   :  { %v305_v17 = vpop.permute.xlu1 %304  ;;  %v417_v18 = vpop.permute.xlu0 %416 }
 0x219   :  { %v422_v19 = vsel %vm162_vm8, %v417_v18, 0  ;;  %v394_v20 = vpop.permute.xlu2 %393  ;;  %1750 = vmatmul.msk.bf16.vlgmr.msrb.gmra.mxu0 %vm162_vm8, %v277_v13  ;;  %v310_v21 = vsel %vm162_vm8, %v305_v17, 0 }
 0x21a   :  { %v399_v22 = vsel %vm162_vm8, %v394_v20, 0  ;;  %319 = vmatpush.bf16.xpose.msrb.mxu1 %v310_v21 }
 0x21b   :  { %408 = vmatpush.bf16.xpose.msra.mxu0 %v399_v22 }
 0x220   :  { %v506_v23 = vpop.permute.xlu0 %505  ;;  %v415_v28 = vpop.permute.xlu1 %414 }
 0x221   :  { %v511_v24 = vsel %vm162_vm8, %v506_v23, 0  ;;  %v392_v25 = vpop.permute.xlu2 %391  ;;  %1751 = vmatmul.msk.bf16.vlgmr.msrb.gmra.mxu1 %vm162_vm8, %v303_v15 }
 0x222   :  { %431 = vmatpush.bf16.xpose.msra.mxu1 %v422_v19 }
 0x223   :  { %520 = vmatpush.bf16.xpose.msrb.mxu0 %v511_v24 }
 0x228   :  { %v504_v29 = vpop.permute.xlu1 %503  ;;  %v527_v30 = vpop.permute.xlu0 %526 }
 0x229   :  { %v529_v26 = vpop.permute.xlu2 %528  ;;  %1754 = vmatmul.msk.bf16.vlgmr.msra.gmra.mxu0 %vm162_vm8, %v392_v25 }
 0x22a   :  { %v534_v27 = vsel %vm162_vm8, %v529_v26, 0 }
 0x22b   :  { %543 = vmatpush.bf16.xpose.msrb.mxu1 %v534_v27 }
 0x231   :  { %1755 = vmatmul.msk.bf16.vlgmr.msra.gmra.mxu1 %vm162_vm8, %v415_v28 }
 0x239   :  { %1758 = vmatmul.msk.bf16.vlgmr.msrb.gmra.mxu0 %vm162_vm8, %v504_v29 }
 0x241   :  { %1759 = vmatmul.msk.bf16.vlgmr.msrb.gmra.mxu1 %vm162_vm8, %v527_v30 }
 0x27e   :  { %v178_v32 = vpop.f32.mrf.mxu1 }
 0x27f   :  { %v179_v33 = vadd.f32 %v2245_v31, %v178_v32 }
 0x281   :  { %v206_v34 = vsel %vm162_vm8, %v179_v33, -inf }
 0x282   :  { %207 = vmax.xlane.f32.xlu2 %v206_v34 }
 0x286   :  { %v180_v35 = vpop.f32.mrf.mxu1 }
 0x28d   :  { %v202_v37 = vpop.f32.mrf.mxu2 }
 0x28e   :  { %v203_v38 = vadd.f32 %v2252_v36, %v202_v37 }
 0x290   :  { %v209_v39 = vsel %vm162_vm8, %v203_v38, -inf }
 0x291   :  { %210 = vmax.xlane.f32.xlu1 %v209_v39 }
 0x295   :  { %v204_v40 = vpop.f32.mrf.mxu2 }
 0x296   :  { %v295_v41 = vpop.f32.mrf.mxu0 }
 0x297   :  { %v296_v42 = vadd.f32 %v2245_v31, %v295_v41 }
 0x299   :  { %v325_v43 = vsel %vm162_vm8, %v296_v42, -inf }
 0x29a   :  { %326 = vmax.xlane.f32.xlu0 %v325_v43  ;;  %252 = vrot.lane.b32.xlu2 %v2206_v2, %s2092_s24 }
 0x29e   :  { %v297_v44 = vpop.f32.mrf.mxu0  ;;  %v321_v45 = vpop.f32.mrf.mxu1 }
 0x29f   :  { %v322_v56 = vadd.f32 %v2252_v36, %v321_v45 }
 0x2a1   :  { %v328_v59 = vsel %vm162_vm8, %v322_v56, -inf }
 0x2a2   :  { %370 = vrot.lane.b32.xlu2 %v2206_v2, %s2093_s1 }
 0x2a6   :  { %v323_v46 = vpop.f32.mrf.mxu1  ;;  %v410_v47 = vpop.f32.mrf.mxu0 }
 0x2a7   :  { %v411_v61 = vadd.f32 %v2245_v31, %v410_v47 }
 0x2a9   :  { %v437_v0 = vsel %vm162_vm8, %v411_v61, -inf }
 0x2aa   :  { %230 = vrot.lane.b32.xlu1 %v2200_v58, %s2092_s24 }
 0x2ae   :  { %349 = vrot.lane.b32.xlu0 %v2200_v58, %s2093_s1  ;;  %v412_v48 = vpop.f32.mrf.mxu0  ;;  %v433_v49 = vpop.f32.mrf.mxu1 }
 0x2af   :  { %v434_v63 = vadd.f32 %v2252_v36, %v433_v49 }
 0x2b1   :  { %v440_v1 = vsel %vm162_vm8, %v434_v63, -inf }
 0x2b6   :  { %v435_v52 = vpop.f32.mrf.mxu1  ;;  %v522_v53 = vpop.f32.mrf.mxu0 }
 0x2b7   :  { %v523_v3 = vadd.f32 %v2245_v31, %v522_v53 }
 0x2b9   :  { %v549_v4 = vsel %vm162_vm8, %v523_v3, -inf }
 0x2be   :  { %v524_v54 = vpop.f32.mrf.mxu0  ;;  %v545_v55 = vpop.f32.mrf.mxu1 }
 0x2bf   :  { %v2269_v60 = vadd.f32 %v2252_v36, %v545_v55 }
 0x2c1   :  { %v552_v62 = vsel %vm162_vm8, %v2269_v60, -inf }
 0x2c6   :  { %v547_v57 = vpop.f32.mrf.mxu1 }
 0x2cb   :  { %329 = vmax.xlane.f32.xlu2 %v328_v59 }
 0x2d3   :  { %553 = vmax.xlane.f32.xlu2 %v552_v62 }
 0x2d4   :  { %438 = vmax.xlane.f32.xlu1 %v437_v0 }
 0x2d8   :  { %441 = vmax.xlane.f32.xlu0 %v440_v1 }
 0x2e0   :  { %550 = vmax.xlane.f32.xlu0 %v549_v4 }
 0x2f5   :  { %v208_v5 = vpop.xlane.xlu2 %207 }
 0x2f6   :  { %v212_v6 = vsub.f32 %v179_v33, %v208_v5 }
 0x2f8   :  { %v214_v7 = vmul.f32 1.442695, %v212_v6 }
 0x2fa   :  { %1970 = vpow2.f32 %v214_v7 }
 0x2fd   :  { %v253_v19 = vpop.permute.xlu2 %252 }
 0x2fe   :  { %v258_v23 = vsel %vm235_vm9, %v253_v19, 0 }
 0x300   :  { %v2279_v8 = vpop.eup %1970 }
 0x301   :  { %v218_v9 = vsel %vm162_vm8, %v2279_v8, 0.0 }
 0x302   :  { %219 = vadd.xlane.f32.xlu2 %v218_v9 }
 0x304   :  { %v211_v11 = vpop.xlane.xlu1 %210 }
 0x305   :  { %v213_v14 = vsub.f32 %v203_v38, %v211_v11  ;;  %v371_v27 = vpop.permute.xlu2 %370 }
 0x307   :  { %v216_v16 = vmul.f32 1.442695, %v213_v14 }
 0x30d   :  { %v327_v12 = vpop.xlane.xlu0 %326 }
 0x30e   :  { %v331_v13 = vsub.f32 %v296_v42, %v327_v12 }
 0x310   :  { %v333_v15 = vmul.f32 1.442695, %v331_v13 }
 0x312   :  { %1972 = vpow2.f32 %v333_v15 }
 0x313   :  { %1974 = vpow2.f32 %v216_v16 }
 0x318   :  { %v2283_v17 = vpop.eup %1972 }
 0x319   :  { %v337_v18 = vsel %vm162_vm8, %v2283_v17, 0.0  ;;  %v2290_v22 = vpop.eup %1974 }
 0x31a   :  { %338 = vadd.xlane.f32.xlu0 %v337_v18  ;;  %482 = vrot.lane.b32.xlu2 %v2206_v2, %s2094_s0  ;;  %v221_v26 = vsel %vm162_vm8, %v2290_v22, 0.0 }
 0x31c   :  { %v231_v20 = vpop.permute.xlu1 %230 }
 0x31d   :  { %v237_v21 = vsel %vm235_vm9, %v231_v20, 0 }
 0x31e   :  { %246 = vmatpush.bf16.msra.mxu3 %v237_v21 }
 0x320   :  { %v350_v24 = vpop.permute.xlu0 %349 }
 0x321   :  { %v355_v25 = vsel %vm235_vm9, %v350_v24, 0 }
 0x322   :  { %267 = vmatpush.bf16.msrb.mxu3 %v258_v23  ;;  %364 = vmatpush.bf16.msrb.mxu2 %v355_v25 }
 0x323   :  { %222 = vadd.xlane.f32.xlu0 %v221_v26 }
 0x33e   :  { %v330_v28 = vpop.xlane.xlu2 %329 }
 0x33f   :  { %v332_v29 = vsub.f32 %v322_v56, %v330_v28 }
 0x341   :  { %v335_v30 = vmul.f32 1.442695, %v332_v29 }
 0x343   :  { %1976 = vpow2.f32 %v335_v30 }
 0x346   :  { %v554_v52 = vpop.xlane.xlu2 %553 }
 0x347   :  { %v439_v32 = vpop.xlane.xlu1 %438  ;;  %v556_v55 = vsub.f32 %v2269_v60, %v554_v52 }
 0x348   :  { %v443_v33 = vsub.f32 %v411_v61, %v439_v32  ;;  %v376_v61 = vsel %vm235_vm9, %v371_v27, 0 }
 0x349   :  { %v1977_v34 = vpop.eup %1976  ;;  %v559_v59 = vmul.f32 1.442695, %v556_v55 }
 0x34a   :  { %v445_v35 = vmul.f32 1.442695, %v443_v33  ;;  %v340_v37 = vsel %vm162_vm8, %v1977_v34, 0.0 }
 0x34b   :  { %v442_v38 = vpop.xlane.xlu0 %441  ;;  %341 = vadd.xlane.f32.xlu1 %v340_v37 }
 0x34c   :  { %1978 = vpow2.f32 %v445_v35  ;;  %v444_v39 = vsub.f32 %v434_v63, %v442_v38 }
 0x34e   :  { %v447_v40 = vmul.f32 1.442695, %v444_v39 }
 0x350   :  { %1980 = vpow2.f32 %v447_v40 }
 0x352   :  { %v2297_v41 = vpop.eup %1978 }
 0x353   :  { %v551_v42 = vpop.xlane.xlu0 %550  ;;  %v449_v43 = vsel %vm162_vm8, %v2297_v41, 0.0 }
 0x354   :  { %v555_v44 = vsub.f32 %v523_v3, %v551_v42  ;;  %450 = vadd.xlane.f32.xlu2 %v449_v43 }
 0x356   :  { %v1981_v45 = vpop.eup %1980  ;;  %v557_v46 = vmul.f32 1.442695, %v555_v44 }
 0x357   :  { %v452_v47 = vsel %vm162_vm8, %v1981_v45, 0.0 }
 0x358   :  { %1982 = vpow2.f32 %v557_v46  ;;  %453 = vadd.xlane.f32.xlu0 %v452_v47 }
 0x35e   :  { %v2302_v48 = vpop.eup %1982 }
 0x35f   :  { %v561_v49 = vsel %vm162_vm8, %v2302_v48, 0.0 }
 0x360   :  { %562 = vadd.xlane.f32.xlu0 %v561_v49 }
 0x364   :  { %461 = vrot.lane.b32.xlu1 %v2200_v58, %s2094_s0 }
 0x36c   :  { %594 = vrot.lane.b32.xlu2 %v2206_v2, %s2095_s25 }
 0x374   :  { %573 = vrot.lane.b32.xlu0 %v2200_v58, %s2095_s25 }
 0x375   :  { %v220_v53 = vpop.xlane.xlu2 %219 }
 0x376   :  { %1984 = vrcp.f32 %v220_v53 }
 0x377   :  { %1986 = vpow2.f32 %v559_v59  ;;  %v1892_v59 = vld [vmem:[%s2624_s5 + $0x8] sm:$0xff] }
 0x378   :  { %674 = vmatpush.bf16.msra.mxu0 %v1892_v59 }
 0x37c   :  { %v1985_v54 = vpop.eup %1984 }
 0x37d   :  { %v226_v56 = vmul.f32 %v1985_v54, %v2279_v8  ;;  %v1987_v2 = vpop.eup %1986  ;;  %v483_v5 = vpop.permute.xlu2 %482 }
 0x37e   :  { %v564_v63 = vsel %vm162_vm8, %v1987_v2, 0.0  ;;  %v488_v7 = vsel %vm235_vm9, %v483_v5, 0 }
 0x37f   :  { %v228_v57 = vpack.c.bf16 %v226_v56, %v226_v56 }
 0x381   :  { %1748 = vmatmul.msk.bf16.vlgmr.msra.gmra.mxu3 %vm162_vm8, %v228_v57 }
 0x382   :  { %385 = vmatpush.bf16.msra.mxu3 %v376_v61  ;;  %v1891_v61 = vld [vmem:[%s2624_s5] sm:$0xff] }
 0x383   :  { %675 = vmatpush.bf16.msra.mxu0 %v1891_v61 }
 0x38d   :  { %v339_v62 = vpop.xlane.xlu0 %338 }
 0x38e   :  { %1988 = vrcp.f32 %v339_v62  ;;  %565 = vadd.xlane.f32.xlu1 %v564_v63 }
 0x394   :  { %v1989_v58 = vpop.eup %1988 }
 0x395   :  { %v345_v0 = vmul.f32 %v1989_v58, %v2283_v17 }
 0x396   :  { %v223_v60 = vpop.xlane.xlu0 %222 }
 0x397   :  { %1990 = vrcp.f32 %v223_v60  ;;  %v347_v1 = vpack.c.bf16 %v345_v0, %v345_v0 }
 0x399   :  { %1752 = vmatmul.msk.bf16.vlgmr.msrb.gmra.mxu2 %vm162_vm8, %v347_v1 }
 0x39d   :  { %v1991_v3 = vpop.eup %1990 }
 0x39e   :  { %v227_v4 = vmul.f32 %v1991_v3, %v2290_v22 }
 0x3a0   :  { %v229_v6 = vpack.c.bf16 %v227_v4, %v227_v4 }
 0x3a2   :  { %1749 = vmatmul.msk.bf16.vlgmr.msrb.gmra.mxu3 %vm162_vm8, %v229_v6 }
 0x3a3   :  { %497 = vmatpush.bf16.msrb.mxu3 %v488_v7 }
 0x3be   :  { %v342_v8 = vpop.xlane.xlu1 %341 }
 0x3bf   :  { %1992 = vrcp.f32 %v342_v8 }
 0x3c5   :  { %v1993_v9 = vpop.eup %1992 }
 0x3c6   :  { %v346_v11 = vmul.f32 %v1993_v9, %v1977_v34 }
 0x3c7   :  { %v451_v12 = vpop.xlane.xlu2 %450 }
 0x3c8   :  { %v348_v13 = vpack.c.bf16 %v346_v11, %v346_v11  ;;  %1994 = vrcp.f32 %v451_v12 }
 0x3ca   :  { %1753 = vmatmul.msk.bf16.vlgmr.msra.gmra.mxu3 %vm162_vm8, %v348_v13  ;;  %v2351_v13 = vld [vmem:[%s2628_s9] sm:$0x3f] }
 0x3cb   :  { %v454_v14 = vpop.xlane.xlu0 %453  ;;  %v731_v61 = vperm.slane %v2351_v13, 2 }
 0x3cc   :  { %1996 = vrcp.f32 %v454_v14  ;;  %v652_v14 = vperm.slane %v2351_v13, 0 }
 0x3ce   :  { %v1995_v17 = vpop.eup %1994 }
 0x3cf   :  { %v595_v15 = vpop.permute.xlu2 %594  ;;  %v457_v20 = vmul.f32 %v1995_v17, %v2297_v41 }
 0x3d0   :  { %v600_v16 = vsel %vm235_vm9, %v595_v15, 0 }
 0x3d1   :  { %609 = vmatpush.bf16.msra.mxu3 %v600_v16  ;;  %v459_v24 = vpack.c.bf16 %v457_v20, %v457_v20 }
 0x3d2   :  { %v1997_v18 = vpop.eup %1996 }
 0x3d3   :  { %v458_v19 = vmul.f32 %v1997_v18, %v1981_v45  ;;  %v563_v25 = vpop.xlane.xlu0 %562 }
 0x3d4   :  { %1998 = vrcp.f32 %v563_v25 }
 0x3d5   :  { %v460_v23 = vpack.c.bf16 %v458_v19, %v458_v19 }
 0x3d6   :  { %v462_v21 = vpop.permute.xlu1 %461 }
 0x3d7   :  { %v467_v22 = vsel %vm235_vm9, %v462_v21, 0 }
 0x3d8   :  { %476 = vmatpush.bf16.msra.mxu2 %v467_v22 }
 0x3da   :  { %1757 = vmatmul.msk.bf16.vlgmr.msrb.gmra.mxu3 %vm162_vm8, %v460_v23  ;;  %v1999_v26 = vpop.eup %1998 }
 0x3db   :  { %1756 = vmatmul.msk.bf16.vlgmr.msra.gmra.mxu2 %vm162_vm8, %v459_v24  ;;  %v569_v27 = vmul.f32 %v1999_v26, %v2302_v48 }
 0x3dd   :  { %v571_v30 = vpack.c.bf16 %v569_v27, %v569_v27 }
 0x3e6   :  { %v574_v28 = vpop.permute.xlu0 %573 }
 0x3e7   :  { %v579_v29 = vsel %vm235_vm9, %v574_v28, 0 }
 0x3e8   :  { %588 = vmatpush.bf16.msrb.mxu2 %v579_v29 }
 0x3eb   :  { %1760 = vmatmul.msk.bf16.vlgmr.msrb.gmra.mxu2 %vm162_vm8, %v571_v30 }
 0x401   :  { %v566_v32 = vpop.xlane.xlu1 %565 }
 0x402   :  { %2000 = vrcp.f32 %v566_v32 }
 0x404   :  { %v248_v33 = vpop.f32.mrf.mxu3 }
 0x408   :  { %v2001_v34 = vpop.eup %2000 }
 0x409   :  { %v570_v35 = vmul.f32 %v2001_v34, %v1987_v2 }
 0x40b   :  { %v572_v37 = vpack.c.bf16 %v570_v35, %v570_v35 }
 0x40c   :  { %v250_v38 = vpop.f32.mrf.mxu3 }
 0x40d   :  { %1761 = vmatmul.msk.bf16.vlgmr.msra.gmra.mxu3 %vm162_vm8, %v572_v37  ;;  %v1893_v37 = vld [vmem:[%s2625_s6] sm:$0xff] }
 0x41c   :  { %v366_v39 = vpop.f32.mrf.mxu2 }
 0x424   :  { %v368_v41 = vpop.f32.mrf.mxu2 }
 0x425   :  { %v269_v40 = vpop.f32.mrf.mxu3 }
 0x42d   :  { %v271_v42 = vpop.f32.mrf.mxu3 }
 0x44d   :  { %v387_v43 = vpop.f32.mrf.mxu3 }
 0x44e   :  { %v1927_v44 = vpack.i.bf16 %v387_v43, %v366_v39 }
 0x450   :  { %1928 = vrot.lane.b32.xlu0 %v1927_v44, %s2634_s26 }
 0x455   :  { %v389_v45 = vpop.f32.mrf.mxu3 }
 0x45d   :  { %v499_v46 = vpop.f32.mrf.mxu3 }
 0x45e   :  { %v478_v47 = vpop.f32.mrf.mxu2 }
 0x45f   :  { %v1932_v48 = vpack.i.bf16 %v499_v46, %v478_v47 }
 0x461   :  { %1933 = vrot.lane.b32.xlu2 %v1932_v48, %s2633_s27 }
 0x465   :  { %v501_v49 = vpop.f32.mrf.mxu3 }
 0x466   :  { %v480_v52 = vpop.f32.mrf.mxu2 }
 0x46e   :  { %v590_v53 = vpop.f32.mrf.mxu2 }
 0x476   :  { %v592_v54 = vpop.f32.mrf.mxu2 }
 0x490   :  { %v611_v55 = vpop.f32.mrf.mxu3 }
 0x491   :  { %v1937_v56 = vpack.i.bf16 %v611_v55, %v590_v53  ;;  %v728_v55 = vperm.slane %v2351_v13, 1 }
 0x493   :  { %1938 = vrot.lane.b32.xlu0 %v1937_v56, %s2632_s28 }
 0x498   :  { %v613_v57 = vpop.f32.mrf.mxu3 }
 0x4bb   :  { %v1934_v58 = vpop.permute.xlu2 %1933 }
 0x4bc   :  { %v1936_v1 = vunpack.i.h.bf16 %v1934_v58  ;;  %v1935_v3 = vunpack.i.l.bf16 %v1934_v58 }
 0x4c2   :  { %v1929_v2 = vpop.permute.xlu0 %1928 }
 0x4c3   :  { %v1931_v62 = vunpack.i.h.bf16 %v1929_v2  ;;  %v1930_v63 = vunpack.i.l.bf16 %v1929_v2 }
 0x4c5   :  { %v640_v0 = vsel %vm162_vm8, %v269_v40, %v1931_v62  ;;  %v639_v60 = vsel %vm162_vm8, %v248_v33, %v1930_v63 }
 0x4c6   :  { %v642_v7 = vsel %vm641_vm10, %v639_v60, %v1935_v3  ;;  %v643_v8 = vsel %vm641_vm10, %v640_v0, %v1936_v1  ;;  %v1898_v1 = vld [vmem:[%s2627_s8 + $0x18] sm:$0xff]  ;;  %v1897_v3 = vld [vmem:[%s2627_s8 + $0x10] sm:$0xff] }
 0x4c7   :  { %832 = vmatpush.bf16.msra.mxu2 %v1898_v1 }
 0x4cb   :  { %833 = vmatpush.bf16.msra.mxu2 %v1897_v3 }
 0x505   :  { %v1939_v4 = vpop.permute.xlu0 %1938 }
 0x506   :  { %v1941_v5 = vunpack.i.h.bf16 %v1939_v4  ;;  %v1940_v6 = vunpack.i.l.bf16 %v1939_v4  ;;  %v1896_v4 = vld [vmem:[%s2627_s8 + $0x8] sm:$0xff] }
 0x507   :  { %834 = vmatpush.bf16.msra.mxu2 %v1896_v4 }
 0x508   :  { %v645_v9 = vsel %vm644_vm11, %v642_v7, %v1940_v6  ;;  %v646_v11 = vsel %vm644_vm11, %v643_v8, %v1941_v5  ;;  %v1895_v5 = vld [vmem:[%s2627_s8] sm:$0xff] }
 0x509   :  { %v647_v12 = vpack.c.bf16 %v646_v11, %v645_v9  ;;  %v1960_v6 = vld [vmem:[%s2626_s7] ss:$0 sm:$0xff] }
 0x50b   :  { %1770 = vmatmul.msk.bf16.vlgmr.msra.gmra.mxu0 %vm46_vm0, %v647_v12  ;;  %835 = vmatpush.bf16.msra.mxu2 %v1895_v5 }
 0x588   :  { %v677_v15 = vpop.f32.mrf.mxu0 }
 0x589   :  { %v678_v16 = vadd.f32 %v677_v15, %v652_v14 }
 0x58b   :  { %v682_v17 = vadd.f32 %v678_v16, %v2190_v50 }
 0x58d   :  { %v684_v18 = vsel %vm46_vm0, %v682_v17, 0.0 }
 0x58e   :  { %685 = vadd.xlane.f32.xlu2 %v684_v18 }
 0x590   :  { %v679_v19 = vpop.f32.mrf.mxu0 }
 0x591   :  { %v680_v20 = vadd.f32 %v679_v19, %v652_v14 }
 0x593   :  { %v683_v21 = vadd.f32 %v680_v20, %v2192_v51  ;;  %v1894_v51 = vld [vmem:[%s2625_s6 + $0x8] sm:$0xff] }
 0x594   :  { %764 = vmatpush.bf16.msra.mxu1 %v1894_v51 }
 0x595   :  { %v687_v22 = vsel %vm46_vm0, %v683_v21, 0.0 }
 0x596   :  { %688 = vadd.xlane.f32.xlu0 %v687_v22 }
 0x598   :  { %765 = vmatpush.bf16.msra.mxu1 %v1893_v37 }
 0x601   :  { %v686_v23 = vpop.xlane.xlu2 %685 }
 0x602   :  { %v690_v24 = vmul.f32 %v686_v23, %v2173_v10 }
 0x604   :  { %v692_v25 = vsub.f32 %v682_v17, %v690_v24 }
 0x606   :  { %v694_v26 = vmul.f32 %v692_v25, %v692_v25 }
 0x608   :  { %v696_v27 = vsel %vm46_vm0, %v694_v26, 0.0 }
 0x609   :  { %v689_v28 = vpop.xlane.xlu0 %688  ;;  %697 = vadd.xlane.f32.xlu1 %v696_v27 }
 0x60a   :  { %v691_v50 = vmul.f32 %v689_v28, %v2173_v10 }
 0x60c   :  { %v693_v29 = vsub.f32 %v683_v21, %v691_v50 }
 0x60e   :  { %v695_v30 = vmul.f32 %v693_v29, %v693_v29 }
 0x610   :  { %v699_v32 = vsel %vm46_vm0, %v695_v30, 0.0 }
 0x611   :  { %700 = vadd.xlane.f32.xlu1 %v699_v32  ;;  %v799_v32 = vperm.slane %v2351_v13, 3 }
 0x67c   :  { %v698_v33 = vpop.xlane.xlu1 %697 }
 0x67d   :  { %v702_v34 = vmul.f32 %v698_v33, %v2173_v10 }
 0x67f   :  { %v704_v35 = vadd.f32 1e-12, %v702_v34 }
 0x681   :  { %2002 = vrsqrt.f32 %v704_v35  ;;  %vm712_vm13 = vweird.f32 %v704_v35 }
 0x684   :  { %v701_v38 = vpop.xlane.xlu1 %700 }
 0x685   :  { %v703_v39 = vmul.f32 %v701_v38, %v2173_v10 }
 0x687   :  { %v2003_v40 = vpop.eup %2002  ;;  %v705_v41 = vadd.f32 1e-12, %v703_v39 }
 0x688   :  { %v707_v42 = vmul.f32 %v2003_v40, %v704_v35  ;;  %vm713_vm12 = vweird.f32 %v2003_v40 }
 0x689   :  { %2004 = vrsqrt.f32 %v705_v41  ;;  %vm714_vm14 = vmor %vm712_vm13, %vm713_vm12  ;;  %vm722_vm1 = vweird.f32 %v705_v41 }
 0x68a   :  { %v708_v43 = vmul.f32 %v2003_v40, %v707_v42 }
 0x68c   :  { %v709_v44 = vmul.f32 0.5, %v708_v43 }
 0x68e   :  { %v710_v45 = vsub.f32 1.5, %v709_v44 }
 0x68f   :  { %v2005_v46 = vpop.eup %2004 }
 0x690   :  { %v711_v47 = vmul.f32 %v2003_v40, %v710_v45  ;;  %v717_v48 = vmul.f32 %v2005_v46, %v705_v41  ;;  %vm723_vm15 = vweird.f32 %v2005_v46 }
 0x691   :  { %vm724_vm2 = vmor %vm722_vm1, %vm723_vm15 }
 0x692   :  { %v718_v49 = vmul.f32 %v2005_v46, %v717_v48  ;;  %v715_v52 = vsel %vm714_vm14, %v2003_v40, %v711_v47 }
 0x693   :  { %v726_v56 = vmul.f32 %v715_v52, %v692_v25 }
 0x694   :  { %v719_v53 = vmul.f32 0.5, %v718_v49 }
 0x695   :  { %v729_v2 = vmul.f32 %v728_v55, %v726_v56 }
 0x696   :  { %v720_v54 = vsub.f32 1.5, %v719_v53  ;;  %v1900_v53 = vld [vmem:[%s2622_s3 + $0x18] sm:$0xff] }
 0x697   :  { %v732_v58 = vadd.f32 %v731_v61, %v729_v2  ;;  %928 = vmatpush.bf16.msrb.mxu3 %v1900_v53 }
 0x698   :  { %v721_v57 = vmul.f32 %v2005_v46, %v720_v54 }
 0x69a   :  { %v725_v59 = vsel %vm724_vm2, %v2005_v46, %v721_v57  ;;  %v1899_v57 = vld [vmem:[%s2622_s3 + $0x10] sm:$0xff] }
 0x69b   :  { %v727_v62 = vmul.f32 %v725_v59, %v693_v29  ;;  %929 = vmatpush.bf16.msrb.mxu3 %v1899_v57 }
 0x69d   :  { %v730_v63 = vmul.f32 %v728_v55, %v727_v62 }
 0x69f   :  { %v733_v0 = vadd.f32 %v731_v61, %v730_v63 }
 0x6a1   :  { %v734_v60 = vpack.c.bf16 %v733_v0, %v732_v58 }
 0x6a3   :  { %1779 = vmatmul.msk.bf16.vlgmr.msra.gmra.mxu1 %vm46_vm0, %v734_v60 }
 0x720   :  { %v767_v7 = vpop.f32.mrf.mxu1 }
 0x721   :  { %v768_v8 = vadd.f32 %v1960_v6, %v767_v7 }
 0x723   :  { %v774_v9 = vmul.f32 0.044715, %v768_v8  ;;  %v772_v26 = vmul.f32 0.5, %v768_v8 }
 0x725   :  { %v776_v11 = vmul.f32 %v774_v9, %v768_v8  ;;  %v888_v9 = vperm.slane %v2351_v13, 4 }
 0x727   :  { %v778_v12 = vmul.f32 %v776_v11, %v768_v8 }
 0x728   :  { %v769_v14 = vpop.f32.mrf.mxu1 }
 0x729   :  { %v780_v15 = vadd.f32 %v778_v12, %v768_v8  ;;  %v770_v16 = vadd.f32 %v1960_v6, %v769_v14 }
 0x72b   :  { %v775_v17 = vmul.f32 0.044715, %v770_v16  ;;  %v782_v18 = vmul.f32 0.7978846, %v780_v15  ;;  %v773_v27 = vmul.f32 0.5, %v770_v16  ;;  %v891_v15 = vperm.slane %v2351_v13, 5 }
 0x72d   :  { %v777_v19 = vmul.f32 %v775_v17, %v770_v16  ;;  %2006 = vtanh.f32 %v782_v18 }
 0x72f   :  { %v779_v20 = vmul.f32 %v777_v19, %v770_v16 }
 0x731   :  { %v781_v21 = vadd.f32 %v779_v20, %v770_v16 }
 0x733   :  { %v783_v22 = vmul.f32 0.7978846, %v781_v21  ;;  %v2007_v23 = vpop.eup %2006 }
 0x734   :  { %v786_v24 = vadd.f32 1.0, %v2007_v23 }
 0x735   :  { %2008 = vtanh.f32 %v783_v22  ;;  %v1961_v22 = vld [vmem:[%s2623_s4 + $0x1] ss:$0 sm:$0xff]  ;;  %s2635_s4 = smov 8  }
 0x736   :  { %v788_v50 = vmul.f32 %v786_v24, %v772_v26 }
 0x73b   :  { %v2009_v25 = vpop.eup %2008 }
 0x73c   :  { %v787_v28 = vadd.f32 1.0, %v2009_v25 }
 0x73e   :  { %v789_v29 = vmul.f32 %v787_v28, %v773_v27 }
 0x740   :  { %v790_v30 = vpack.c.bf16 %v789_v29, %v788_v50 }
 0x742   :  { %1796 = vmatmul.msk.bf16.vlgmr.msra.gmra.mxu2 %vm824_vm3, %v790_v30 }
 0x7c5   :  { %v837_v51 = vpop.f32.mrf.mxu2 }
 0x7c6   :  { %v838_v33 = vadd.f32 %v837_v51, %v799_v32 }
 0x7c8   :  { %v842_v34 = vadd.f32 %v838_v33, %v732_v58 }
 0x7ca   :  { %v844_v35 = vsel %vm46_vm0, %v842_v34, 0.0 }
 0x7cb   :  { %845 = vadd.xlane.f32.xlu1 %v844_v35 }
 0x7cd   :  { %v839_v37 = vpop.f32.mrf.mxu2 }
 0x7ce   :  { %v840_v38 = vadd.f32 %v839_v37, %v799_v32 }
 0x7d0   :  { %v843_v39 = vadd.f32 %v840_v38, %v733_v0 }
 0x7d2   :  { %v847_v40 = vsel %vm46_vm0, %v843_v39, 0.0 }
 0x7d3   :  { %848 = vadd.xlane.f32.xlu1 %v847_v40 }
 0x83e   :  { %v846_v41 = vpop.xlane.xlu1 %845 }
 0x83f   :  { %v850_v42 = vmul.f32 %v846_v41, %v2173_v10 }
 0x841   :  { %v852_v43 = vsub.f32 %v842_v34, %v850_v42 }
 0x843   :  { %v854_v44 = vmul.f32 %v852_v43, %v852_v43 }
 0x845   :  { %v856_v45 = vsel %vm46_vm0, %v854_v44, 0.0 }
 0x846   :  { %857 = vadd.xlane.f32.xlu1 %v856_v45  ;;  %v849_v46 = vpop.xlane.xlu1 %848 }
 0x847   :  { %v851_v47 = vmul.f32 %v849_v46, %v2173_v10 }
 0x849   :  { %v853_v48 = vsub.f32 %v843_v39, %v851_v47 }
 0x84b   :  { %v855_v49 = vmul.f32 %v853_v48, %v853_v48 }
 0x84d   :  { %v859_v52 = vsel %vm46_vm0, %v855_v49, 0.0 }
 0x84e   :  { %860 = vadd.xlane.f32.xlu2 %v859_v52 }
 0x8b9   :  { %v858_v54 = vpop.xlane.xlu1 %857 }
 0x8ba   :  { %v862_v55 = vmul.f32 %v858_v54, %v2173_v10 }
 0x8bc   :  { %v864_v56 = vadd.f32 1e-12, %v862_v55 }
 0x8be   :  { %2010 = vrsqrt.f32 %v864_v56  ;;  %vm872_vm5 = vweird.f32 %v864_v56 }
 0x8c1   :  { %v861_v59 = vpop.xlane.xlu2 %860 }
 0x8c2   :  { %v863_v61 = vmul.f32 %v861_v59, %v2173_v10 }
 0x8c4   :  { %v2011_v2 = vpop.eup %2010  ;;  %v865_v62 = vadd.f32 1e-12, %v863_v61 }
 0x8c5   :  { %v867_v63 = vmul.f32 %v2011_v2, %v864_v56  ;;  %vm873_vm4 = vweird.f32 %v2011_v2 }
 0x8c6   :  { %2012 = vrsqrt.f32 %v865_v62  ;;  %vm874_vm6 = vmor %vm872_vm5, %vm873_vm4  ;;  %vm882_vm12 = vweird.f32 %v865_v62 }
 0x8c7   :  { %v868_v58 = vmul.f32 %v2011_v2, %v867_v63 }
 0x8c9   :  { %v869_v0 = vmul.f32 0.5, %v868_v58 }
 0x8cb   :  { %v870_v60 = vsub.f32 1.5, %v869_v0 }
 0x8cc   :  { %v2013_v1 = vpop.eup %2012 }
 0x8cd   :  { %v871_v3 = vmul.f32 %v2011_v2, %v870_v60  ;;  %v877_v4 = vmul.f32 %v2013_v1, %v865_v62  ;;  %vm883_vm7 = vweird.f32 %v2013_v1 }
 0x8ce   :  { %vm884_vm13 = vmor %vm882_vm12, %vm883_vm7  ;;  %vm1681_vm7 = vcmask 1040384  }
 0x8cf   :  { %v878_v5 = vmul.f32 %v2013_v1, %v877_v4  ;;  %v875_v6 = vsel %vm874_vm6, %v2011_v2, %v871_v3 }
 0x8d0   :  { %v886_v11 = vmul.f32 %v875_v6, %v852_v43 }
 0x8d1   :  { %v879_v7 = vmul.f32 0.5, %v878_v5 }
 0x8d2   :  { %v889_v16 = vmul.f32 %v888_v9, %v886_v11 }
 0x8d3   :  { %v880_v8 = vsub.f32 1.5, %v879_v7 }
 0x8d4   :  { %v2406_v19 = vadd.f32 %v891_v15, %v889_v16 }
 0x8d5   :  { %v881_v12 = vmul.f32 %v2013_v1, %v880_v8 }
 0x8d7   :  { %v885_v14 = vsel %vm884_vm13, %v2013_v1, %v881_v12 }
 0x8d8   :  { %v887_v17 = vmul.f32 %v885_v14, %v853_v48 }
 0x8da   :  { %v890_v18 = vmul.f32 %v888_v9, %v887_v17 }
 0x8dc   :  { %v2408_v20 = vadd.f32 %v891_v15, %v890_v18 }
 0x8de   :  { %v896_v21 = vpack.c.bf16 %v2408_v20, %v2406_v19 }
 0x8e0   :  { %1811 = vmatmul.msk.bf16.vlgmr.msrb.gmra.mxu3 %vm46_vm0, %v896_v21 }
 0x963   :  { %v931_v23 = vpop.f32.mrf.mxu3 }
 0x964   :  { %v932_v24 = vadd.f32 %v1961_v22, %v931_v23 }
 0x966   :  { %v936_v25 = vmul.f32 0.35355338, %v932_v24  ;;  %v940_v13 = vpack.c.bf16 %v932_v24, %v932_v24 }
 0x968   :  { %v943_v26 = vunpack.c.l.b16 %v940_v13  ;;  %v938_v27 = vpack.c.bf16 %v936_v25, %v936_v25 }
 0x96a   :  { %v2416_v28 = vpack.c.b16 %v943_v26, %v943_v26  ;;  %v1057_v51 = vunpack.c.l.b16 %v938_v27 }
 0x96b   :  { %v933_v50 = vpop.f32.mrf.mxu3 }
 0x96c   :  { %v934_v29 = vadd.f32 %v1961_v22, %v933_v50  ;;  %1061 = vrot.lane.b32.xlu2 %v2416_v28, %s2085_s13  ;;  %945 = vrot.lane.b32.xlu1 %v2416_v28, %s2086_s14  ;;  %v1058_v37 = vpack.c.b16 %v1057_v51, %v1057_v51 }
 0x96e   :  { %v937_v30 = vmul.f32 0.35355338, %v934_v29  ;;  %v941_v32 = vpack.c.bf16 %v934_v29, %v934_v29 }
 0x970   :  { %v939_v33 = vpack.c.bf16 %v937_v30, %v937_v30  ;;  %v967_v34 = vunpack.c.l.b16 %v941_v32 }
 0x972   :  { %v2422_v35 = vpack.c.b16 %v967_v34, %v967_v34  ;;  %v1083_v38 = vunpack.c.l.b16 %v939_v33 }
 0x974   :  { %969 = vrot.lane.b32.xlu0 %v2422_v35, %s2086_s14  ;;  %1059 = vrot.lane.b32.xlu1 %v1058_v37, %s2090_s18  ;;  %v1084_v39 = vpack.c.b16 %v1083_v38, %v1083_v38  ;;  %s2637_s14 = smov 24  }
 0x976   :  { %1085 = vrot.lane.b32.xlu2 %v1084_v39, %s2090_s18 }
 0x97c   :  { %1087 = vrot.lane.b32.xlu0 %v2422_v35, %s2085_s13  ;;  %1199 = vrot.lane.b32.xlu1 %v2422_v35, %s2087_s15  ;;  %s2636_s13 = smov 16  }
 0x97e   :  { %1174 = vrot.lane.b32.xlu2 %v1058_v37, %s2088_s16 }
 0x984   :  { %1176 = vrot.lane.b32.xlu0 %v2416_v28, %s2087_s15  ;;  %1288 = vrot.lane.b32.xlu1 %v2416_v28, %s2089_s17 }
 0x986   :  { %1311 = vrot.lane.b32.xlu2 %v2422_v35, %s2089_s17 }
 0x98c   :  { %1197 = vrot.lane.b32.xlu0 %v1084_v39, %s2088_s16  ;;  %1309 = vrot.lane.b32.xlu1 %v1084_v39, %s2091_s19  ;;  %s1728_s16 = sshll.u32 %s2631_s12, 4  ;;  %s1729_s16 = int_to_ptr.hbm [resolvable:$true] %s1728_s16 }
 0x994   :  { %1286 = vrot.lane.b32.xlu0 %v1058_v37, %s2091_s19 }
 0x99c   :  { %1014 = vrot.lane.b32.xlu0 %v2416_v28, %s2092_s24 }
 0x9c6   :  { %v1062_v40 = vpop.permute.xlu2 %1061 }
 0x9c7   :  { %v1067_v43 = vsel %vm162_vm8, %v1062_v40, 0 }
 0x9d0   :  { %v1086_v47 = vpop.permute.xlu2 %1085 }
 0x9d8   :  { %v1175_v54 = vpop.permute.xlu2 %1174 }
 0x9de   :  { %v946_v41 = vpop.permute.xlu1 %945 }
 0x9df   :  { %v951_v42 = vsel %vm162_vm8, %v946_v41, 0 }
 0x9e0   :  { %960 = vmatpush.bf16.xpose.msrb.mxu0 %v951_v42  ;;  %v1312_v61 = vpop.permute.xlu2 %1311 }
 0x9e1   :  { %v1317_v62 = vsel %vm162_vm8, %v1312_v61, 0 }
 0x9e6   :  { %v970_v44 = vpop.permute.xlu0 %969  ;;  %v1060_v45 = vpop.permute.xlu1 %1059 }
 0x9e7   :  { %v975_v46 = vsel %vm162_vm8, %v970_v44, 0  ;;  %1812 = vmatmul.msk.bf16.vlgmr.msrb.gmra.mxu0 %vm162_vm8, %v938_v27 }
 0x9e8   :  { %1076 = vmatpush.bf16.xpose.msra.mxu0 %v1067_v43  ;;  %984 = vmatpush.bf16.xpose.msrb.mxu1 %v975_v46 }
 0x9ee   :  { %v1088_v48 = vpop.permute.xlu0 %1087  ;;  %v1200_v49 = vpop.permute.xlu1 %1199 }
 0x9ef   :  { %v1093_v52 = vsel %vm162_vm8, %v1088_v48, 0  ;;  %v1205_v53 = vsel %vm162_vm8, %v1200_v49, 0  ;;  %1813 = vmatmul.msk.bf16.vlgmr.msrb.gmra.mxu1 %vm162_vm8, %v939_v33 }
 0x9f0   :  { %1102 = vmatpush.bf16.xpose.msra.mxu1 %v1093_v52 }
 0x9f6   :  { %v1177_v55 = vpop.permute.xlu0 %1176  ;;  %v1289_v56 = vpop.permute.xlu1 %1288 }
 0x9f7   :  { %v1182_v57 = vsel %vm162_vm8, %v1177_v55, 0  ;;  %v1294_v59 = vsel %vm162_vm8, %v1289_v56, 0  ;;  %1816 = vmatmul.msk.bf16.vlgmr.msra.gmra.mxu0 %vm162_vm8, %v1060_v45 }
 0x9f8   :  { %1214 = vmatpush.bf16.xpose.msrb.mxu1 %v1205_v53  ;;  %1191 = vmatpush.bf16.xpose.msrb.mxu0 %v1182_v57 }
 0x9fe   :  { %v1198_v2 = vpop.permute.xlu0 %1197  ;;  %v1310_v60 = vpop.permute.xlu1 %1309 }
 0x9ff   :  { %1817 = vmatmul.msk.bf16.vlgmr.msra.gmra.mxu1 %vm162_vm8, %v1086_v47 }
 0xa00   :  { %1303 = vmatpush.bf16.xpose.msra.mxu0 %v1294_v59  ;;  %1326 = vmatpush.bf16.xpose.msra.mxu1 %v1317_v62 }
 0xa06   :  { %v1287_v63 = vpop.permute.xlu0 %1286 }
 0xa07   :  { %1820 = vmatmul.msk.bf16.vlgmr.msrb.gmra.mxu0 %vm162_vm8, %v1175_v54 }
 0xa0e   :  { %v1015_v58 = vpop.permute.xlu0 %1014 }
 0xa0f   :  { %v1020_v0 = vsel %vm235_vm9, %v1015_v58, 0  ;;  %1821 = vmatmul.msk.bf16.vlgmr.msrb.gmra.mxu1 %vm162_vm8, %v1198_v2 }
 0xa10   :  { %1029 = vmatpush.bf16.msrb.mxu2 %v1020_v0 }
 0xa17   :  { %1824 = vmatmul.msk.bf16.vlgmr.msra.gmra.mxu0 %vm162_vm8, %v1287_v63 }
 0xa1f   :  { %1825 = vmatmul.msk.bf16.vlgmr.msra.gmra.mxu1 %vm162_vm8, %v1310_v60 }
 0xa64   :  { %v962_v1 = vpop.f32.mrf.mxu0 }
 0xa65   :  { %v963_v3 = vadd.f32 %v2245_v31, %v962_v1 }
 0xa67   :  { %v990_v4 = vsel %vm162_vm8, %v963_v3, -inf }
 0xa68   :  { %991 = vmax.xlane.f32.xlu2 %v990_v4 }
 0xa6c   :  { %v964_v5 = vpop.f32.mrf.mxu0  ;;  %v986_v6 = vpop.f32.mrf.mxu1 }
 0xa6d   :  { %v987_v7 = vadd.f32 %v2252_v36, %v986_v6 }
 0xa6f   :  { %v993_v8 = vsel %vm162_vm8, %v987_v7, -inf }
 0xa70   :  { %994 = vmax.xlane.f32.xlu0 %v993_v8 }
 0xa74   :  { %v988_v9 = vpop.f32.mrf.mxu1  ;;  %v1078_v11 = vpop.f32.mrf.mxu0 }
 0xa75   :  { %v1079_v12 = vadd.f32 %v2245_v31, %v1078_v11 }
 0xa77   :  { %v1108_v14 = vsel %vm162_vm8, %v1079_v12, -inf }
 0xa78   :  { %1109 = vmax.xlane.f32.xlu1 %v1108_v14 }
 0xa7c   :  { %v1080_v15 = vpop.f32.mrf.mxu0  ;;  %v1104_v16 = vpop.f32.mrf.mxu1 }
 0xa7d   :  { %v1105_v17 = vadd.f32 %v2252_v36, %v1104_v16 }
 0xa7f   :  { %v1111_v18 = vsel %vm162_vm8, %v1105_v17, -inf }
 0xa80   :  { %1112 = vmax.xlane.f32.xlu2 %v1111_v18 }
 0xa84   :  { %v1106_v21 = vpop.f32.mrf.mxu1  ;;  %v1193_v22 = vpop.f32.mrf.mxu0 }
 0xa85   :  { %v1194_v23 = vadd.f32 %v2245_v31, %v1193_v22 }
 0xa87   :  { %v1220_v24 = vsel %vm162_vm8, %v1194_v23, -inf }
 0xa88   :  { %1221 = vmax.xlane.f32.xlu0 %v1220_v24 }
 0xa8c   :  { %v1195_v25 = vpop.f32.mrf.mxu0  ;;  %v1216_v13 = vpop.f32.mrf.mxu1 }
 0xa8d   :  { %v1217_v26 = vadd.f32 %v2252_v36, %v1216_v13 }
 0xa8f   :  { %v1223_v27 = vsel %vm162_vm8, %v1217_v26, -inf }
 0xa90   :  { %1224 = vmax.xlane.f32.xlu1 %v1223_v27 }
 0xa94   :  { %v1218_v50 = vpop.f32.mrf.mxu1  ;;  %v1305_v29 = vpop.f32.mrf.mxu0 }
 0xa95   :  { %v2474_v30 = vadd.f32 %v2245_v31, %v1305_v29 }
 0xa97   :  { %v1332_v32 = vsel %vm162_vm8, %v2474_v30, -inf }
 0xa98   :  { %1333 = vmax.xlane.f32.xlu2 %v1332_v32 }
 0xa9c   :  { %v1307_v51 = vpop.f32.mrf.mxu0  ;;  %v1328_v33 = vpop.f32.mrf.mxu1 }
 0xa9d   :  { %v1329_v34 = vadd.f32 %v2252_v36, %v1328_v33 }
 0xa9f   :  { %v1335_v37 = vsel %vm162_vm8, %v1329_v34, -inf }
 0xaa0   :  { %1336 = vmax.xlane.f32.xlu0 %v1335_v37 }
 0xaa4   :  { %v1330_v38 = vpop.f32.mrf.mxu1 }
 0xab0   :  { %1153 = vrot.lane.b32.xlu2 %v2422_v35, %s2093_s1 }
 0xab4   :  { %1132 = vrot.lane.b32.xlu0 %v2416_v28, %s2093_s1 }
 0xab8   :  { %1244 = vrot.lane.b32.xlu2 %v2416_v28, %s2094_s0 }
 0xadb   :  { %v992_v31 = vpop.xlane.xlu2 %991 }
 0xadc   :  { %v996_v39 = vsub.f32 %v963_v3, %v992_v31 }
 0xade   :  { %v998_v40 = vmul.f32 1.442695, %v996_v39 }
 0xae0   :  { %2014 = vpow2.f32 %v998_v40 }
 0xae3   :  { %v995_v41 = vpop.xlane.xlu0 %994 }
 0xae4   :  { %v997_v42 = vsub.f32 %v987_v7, %v995_v41 }
 0xae6   :  { %v2015_v36 = vpop.eup %2014  ;;  %v1000_v43 = vmul.f32 1.442695, %v997_v42 }
 0xae7   :  { %v1002_v44 = vsel %vm162_vm8, %v2015_v36, 0.0 }
 0xae8   :  { %2016 = vpow2.f32 %v1000_v43  ;;  %1003 = vadd.xlane.f32.xlu1 %v1002_v44 }
 0xaeb   :  { %v1110_v45 = vpop.xlane.xlu1 %1109 }
 0xaec   :  { %v1114_v46 = vsub.f32 %v1079_v12, %v1110_v45 }
 0xaee   :  { %v2487_v47 = vpop.eup %2016  ;;  %v1116_v48 = vmul.f32 1.442695, %v1114_v46 }
 0xaef   :  { %v1005_v49 = vsel %vm162_vm8, %v2487_v47, 0.0 }
 0xaf0   :  { %2018 = vpow2.f32 %v1116_v48  ;;  %1006 = vadd.xlane.f32.xlu2 %v1005_v49 }
 0xaf3   :  { %v1113_v52 = vpop.xlane.xlu2 %1112 }
 0xaf4   :  { %v1115_v53 = vsub.f32 %v1105_v17, %v1113_v52 }
 0xaf6   :  { %v2019_v54 = vpop.eup %2018  ;;  %v1118_v55 = vmul.f32 1.442695, %v1115_v53 }
 0xaf7   :  { %v1120_v56 = vsel %vm162_vm8, %v2019_v54, 0.0 }
 0xaf8   :  { %2020 = vpow2.f32 %v1118_v55  ;;  %1121 = vadd.xlane.f32.xlu2 %v1120_v56 }
 0xafb   :  { %v1222_v57 = vpop.xlane.xlu0 %1221 }
 0xafc   :  { %v1226_v59 = vsub.f32 %v1194_v23, %v1222_v57 }
 0xafe   :  { %v2492_v61 = vpop.eup %2020  ;;  %v1228_v2 = vmul.f32 1.442695, %v1226_v59 }
 0xaff   :  { %v1123_v62 = vsel %vm162_vm8, %v2492_v61, 0.0 }
 0xb00   :  { %2022 = vpow2.f32 %v1228_v2  ;;  %1124 = vadd.xlane.f32.xlu2 %v1123_v62 }
 0xb01   :  { %1035 = vrot.lane.b32.xlu1 %v2422_v35, %s2092_s24 }
 0xb03   :  { %v1225_v1 = vpop.xlane.xlu1 %1224 }
 0xb04   :  { %v1227_v4 = vsub.f32 %v1217_v26, %v1225_v1 }
 0xb06   :  { %v2498_v63 = vpop.eup %2022  ;;  %v1230_v5 = vmul.f32 1.442695, %v1227_v4 }
 0xb07   :  { %v1232_v58 = vsel %vm162_vm8, %v2498_v63, 0.0 }
 0xb08   :  { %1233 = vadd.xlane.f32.xlu0 %v1232_v58 }
 0xb0b   :  { %v1334_v14 = vpop.xlane.xlu2 %1333 }
 0xb0c   :  { %v1338_v15 = vsub.f32 %v2474_v30, %v1334_v14 }
 0xb0e   :  { %v1340_v16 = vmul.f32 1.442695, %v1338_v15 }
 0xb13   :  { %v1337_v0 = vpop.xlane.xlu0 %1336  ;;  %v1154_v21 = vpop.permute.xlu2 %1153 }
 0xb14   :  { %v1339_v60 = vsub.f32 %v1329_v34, %v1337_v0  ;;  %v1159_v34 = vsel %vm235_vm9, %v1154_v21, 0 }
 0xb16   :  { %v1342_v3 = vmul.f32 1.442695, %v1339_v60 }
 0xb18   :  { %2024 = vpow2.f32 %v1342_v3  ;;  %1265 = vrot.lane.b32.xlu2 %v2422_v35, %s2094_s0 }
 0xb19   :  { %2026 = vpow2.f32 %v1230_v5 }
 0xb1a   :  { %2028 = vpow2.f32 %v1340_v16 }
 0xb1b   :  { %v1245_v22 = vpop.permute.xlu2 %1244 }
 0xb1e   :  { %v2504_v6 = vpop.eup %2024 }
 0xb1f   :  { %v1347_v7 = vsel %vm162_vm8, %v2504_v6, 0.0  ;;  %v2027_v9 = vpop.eup %2026 }
 0xb20   :  { %1348 = vadd.xlane.f32.xlu0 %v1347_v7  ;;  %v1235_v12 = vsel %vm162_vm8, %v2027_v9, 0.0  ;;  %v2513_v17 = vpop.eup %2028 }
 0xb21   :  { %v1344_v18 = vsel %vm162_vm8, %v2513_v17, 0.0 }
 0xb26   :  { %v1133_v8 = vpop.permute.xlu0 %1132 }
 0xb27   :  { %v1138_v11 = vsel %vm235_vm9, %v1133_v8, 0 }
 0xb28   :  { %1147 = vmatpush.bf16.msra.mxu2 %v1138_v11 }
 0xb2b   :  { %1236 = vadd.xlane.f32.xlu1 %v1235_v12 }
 0xb34   :  { %1377 = vrot.lane.b32.xlu0 %v2422_v35, %s2095_s25  ;;  %v1250_v35 = vsel %vm235_vm9, %v1245_v22, 0 }
 0xb41   :  { %1345 = vadd.xlane.f32.xlu2 %v1344_v18 }
 0xb44   :  { %1356 = vrot.lane.b32.xlu1 %v2416_v28, %s2095_s25 }
 0xb5b   :  { %v1004_v23 = vpop.xlane.xlu1 %1003 }
 0xb5c   :  { %2030 = vrcp.f32 %v1004_v23  ;;  %v1902_v23 = vld [vmem:[%s2624_s5 + $0x18] sm:$0xff] }
 0xb5d   :  { %1456 = vmatpush.bf16.msrb.mxu0 %v1902_v23 }
 0xb62   :  { %v2031_v24 = vpop.eup %2030 }
 0xb63   :  { %v1010_v25 = vmul.f32 %v2031_v24, %v2015_v36  ;;  %v1007_v13 = vpop.xlane.xlu2 %1006  ;;  %v1901_v24 = vld [vmem:[%s2624_s5 + $0x10] sm:$0xff] }
 0xb64   :  { %2032 = vrcp.f32 %v1007_v13  ;;  %1457 = vmatpush.bf16.msrb.mxu0 %v1901_v24 }
 0xb65   :  { %v1012_v26 = vpack.c.bf16 %v1010_v25, %v1010_v25 }
 0xb67   :  { %1814 = vmatmul.msk.bf16.vlgmr.msrb.gmra.mxu2 %vm162_vm8, %v1012_v26 }
 0xb68   :  { %1259 = vmatpush.bf16.msrb.mxu2 %v1250_v35 }
 0xb6a   :  { %v2033_v50 = vpop.eup %2032 }
 0xb6b   :  { %v1122_v27 = vpop.xlane.xlu2 %1121  ;;  %v1011_v28 = vmul.f32 %v2033_v50, %v2487_v47 }
 0xb6c   :  { %2034 = vrcp.f32 %v1122_v27 }
 0xb6d   :  { %v1013_v38 = vpack.c.bf16 %v1011_v28, %v1011_v28 }
 0xb72   :  { %v2035_v29 = vpop.eup %2034 }
 0xb73   :  { %v1128_v30 = vmul.f32 %v2035_v29, %v2019_v54  ;;  %v1036_v32 = vpop.permute.xlu1 %1035  ;;  %v1125_v51 = vpop.xlane.xlu2 %1124 }
 0xb74   :  { %v1041_v33 = vsel %vm235_vm9, %v1036_v32, 0  ;;  %2036 = vrcp.f32 %v1125_v51 }
 0xb75   :  { %v1130_v37 = vpack.c.bf16 %v1128_v30, %v1128_v30  ;;  %1050 = vmatpush.bf16.msra.mxu3 %v1041_v33 }
 0xb77   :  { %1818 = vmatmul.msk.bf16.vlgmr.msra.gmra.mxu2 %vm162_vm8, %v1130_v37 }
 0xb78   :  { %1815 = vmatmul.msk.bf16.vlgmr.msra.gmra.mxu3 %vm162_vm8, %v1013_v38 }
 0xb79   :  { %1168 = vmatpush.bf16.msrb.mxu3 %v1159_v34 }
 0xb7a   :  { %v2037_v41 = vpop.eup %2036 }
 0xb7b   :  { %v1234_v31 = vpop.xlane.xlu0 %1233  ;;  %v1266_v39 = vpop.permute.xlu2 %1265  ;;  %v1129_v36 = vmul.f32 %v2037_v41, %v2492_v61 }
 0xb7c   :  { %2038 = vrcp.f32 %v1234_v31  ;;  %v1271_v40 = vsel %vm235_vm9, %v1266_v39, 0  ;;  %v2557_v39 = vld [vmem:[%s2628_s9 + $0x8] sm:$0x3f] }
 0xb7d   :  { %1280 = vmatpush.bf16.msra.mxu3 %v1271_v40  ;;  %v1131_v45 = vpack.c.bf16 %v1129_v36, %v1129_v36  ;;  %v1434_v40 = vperm.slane %v2557_v39, 0 }
 0xb82   :  { %v2039_v42 = vpop.eup %2038 }
 0xb83   :  { %v1240_v43 = vmul.f32 %v2039_v42, %v2498_v63 }
 0xb85   :  { %v1242_v44 = vpack.c.bf16 %v1240_v43, %v1240_v43 }
 0xb87   :  { %1822 = vmatmul.msk.bf16.vlgmr.msrb.gmra.mxu2 %vm162_vm8, %v1242_v44 }
 0xb88   :  { %1819 = vmatmul.msk.bf16.vlgmr.msrb.gmra.mxu3 %vm162_vm8, %v1131_v45 }
 0xb93   :  { %v1349_v46 = vpop.xlane.xlu0 %1348 }
 0xb9e   :  { %v1237_v47 = vpop.xlane.xlu1 %1236 }
 0xb9f   :  { %2040 = vrcp.f32 %v1237_v47 }
 0xba0   :  { %2042 = vrcp.f32 %v1349_v46 }
 0xba5   :  { %v2041_v48 = vpop.eup %2040 }
 0xba6   :  { %v1241_v49 = vmul.f32 %v2041_v48, %v2027_v9  ;;  %v1378_v52 = vpop.permute.xlu0 %1377  ;;  %v2043_v55 = vpop.eup %2042 }
 0xba7   :  { %v1383_v53 = vsel %vm235_vm9, %v1378_v52, 0  ;;  %v1353_v56 = vmul.f32 %v2043_v55, %v2504_v6 }
 0xba8   :  { %v1243_v54 = vpack.c.bf16 %v1241_v49, %v1241_v49  ;;  %1392 = vmatpush.bf16.msrb.mxu3 %v1383_v53 }
 0xba9   :  { %v1355_v2 = vpack.c.bf16 %v1353_v56, %v1353_v56 }
 0xbaa   :  { %1823 = vmatmul.msk.bf16.vlgmr.msra.gmra.mxu3 %vm162_vm8, %v1243_v54 }
 0xbb4   :  { %v1346_v57 = vpop.xlane.xlu2 %1345 }
 0xbb5   :  { %2044 = vrcp.f32 %v1346_v57 }
 0xbb6   :  { %v1357_v59 = vpop.permute.xlu1 %1356 }
 0xbb7   :  { %v1362_v61 = vsel %vm235_vm9, %v1357_v59, 0 }
 0xbb8   :  { %1371 = vmatpush.bf16.msra.mxu2 %v1362_v61 }
 0xbba   :  { %1827 = vmatmul.msk.bf16.vlgmr.msrb.gmra.mxu3 %vm162_vm8, %v1355_v2 }
 0xbbb   :  { %v2045_v62 = vpop.eup %2044 }
 0xbbc   :  { %v1352_v63 = vmul.f32 %v2045_v62, %v2513_v17 }
 0xbbe   :  { %v1354_v58 = vpack.c.bf16 %v1352_v63, %v1352_v63  ;;  %v1903_v63 = vld [vmem:[%s2625_s6 + $0x10] sm:$0xff] }
 0xbc0   :  { %1826 = vmatmul.msk.bf16.vlgmr.msra.gmra.mxu2 %vm162_vm8, %v1354_v58 }
 0xbea   :  { %v1031_v0 = vpop.f32.mrf.mxu2 }
 0xbf2   :  { %v1033_v60 = vpop.f32.mrf.mxu2 }
 0xbfa   :  { %v1149_v1 = vpop.f32.mrf.mxu2 }
 0xbfb   :  { %v1052_v3 = vpop.f32.mrf.mxu3 }
 0xc02   :  { %v1151_v4 = vpop.f32.mrf.mxu2 }
 0xc03   :  { %v1054_v5 = vpop.f32.mrf.mxu3 }
 0xc0a   :  { %v1261_v6 = vpop.f32.mrf.mxu2 }
 0xc0b   :  { %v1170_v7 = vpop.f32.mrf.mxu3 }
 0xc0c   :  { %v1942_v8 = vpack.i.bf16 %v1170_v7, %v1149_v1 }
 0xc0e   :  { %1943 = vrot.lane.b32.xlu1 %v1942_v8, %s2635_s4  ;;  %s2099_s4 = smov [#allocation2]  }
 0xc12   :  { %v1263_v9 = vpop.f32.mrf.mxu2 }
 0xc13   :  { %v1172_v11 = vpop.f32.mrf.mxu3 }
 0xc2d   :  { %v1282_v12 = vpop.f32.mrf.mxu3 }
 0xc2e   :  { %v1947_v14 = vpack.i.bf16 %v1282_v12, %v1261_v6 }
 0xc30   :  { %1948 = vrot.lane.b32.xlu0 %v1947_v14, %s2636_s13  ;;  %s1726_s13 = sshll.u32 %s2099_s4, 4  ;;  %s1727_s13 = int_to_ptr.vmem [resolvable:$true] %s1726_s13 }
 0xc35   :  { %v1284_v15 = vpop.f32.mrf.mxu3 }
 0xc3d   :  { %v1394_v16 = vpop.f32.mrf.mxu3 }
 0xc43   :  { %v1373_v17 = vpop.f32.mrf.mxu2 }
 0xc44   :  { %v1952_v18 = vpack.i.bf16 %v1394_v16, %v1373_v17  ;;  %v1510_v16 = vperm.slane %v2557_v39, 1 }
 0xc45   :  { %v1396_v21 = vpop.f32.mrf.mxu3 }
 0xc46   :  { %1953 = vrot.lane.b32.xlu2 %v1952_v18, %s2637_s14 }
 0xc4b   :  { %v1375_v22 = vpop.f32.mrf.mxu2 }
 0xc4c   :  { %v1513_v22 = vperm.slane %v2557_v39, 2 }
 0xc80   :  { %v1944_v25 = vpop.permute.xlu1 %1943 }
 0xc81   :  { %v1946_v13 = vunpack.i.h.bf16 %v1944_v25  ;;  %v1945_v26 = vunpack.i.l.bf16 %v1944_v25 }
 0xc83   :  { %v1423_v28 = vsel %vm162_vm8, %v1052_v3, %v1946_v13  ;;  %v1422_v30 = vsel %vm162_vm8, %v1031_v0, %v1945_v26 }
 0xca0   :  { %v1954_v35 = vpop.permute.xlu2 %1953 }
 0xca1   :  { %v1956_v32 = vunpack.i.h.bf16 %v1954_v35  ;;  %v1955_v51 = vunpack.i.l.bf16 %v1954_v35 }
 0xca2   :  { %v1949_v27 = vpop.permute.xlu0 %1948 }
 0xca3   :  { %v1951_v50 = vunpack.i.h.bf16 %v1949_v27  ;;  %v1950_v29 = vunpack.i.l.bf16 %v1949_v27  ;;  %v1908_v27 = vld [vmem:[%s2627_s8 + $0x38] sm:$0xff] }
 0xca4   :  { %1616 = vmatpush.bf16.msrb.mxu2 %v1908_v27 }
 0xca5   :  { %v1425_v33 = vsel %vm641_vm10, %v1423_v28, %v1951_v50  ;;  %v1424_v34 = vsel %vm641_vm10, %v1422_v30, %v1950_v29  ;;  %v1907_v50 = vld [vmem:[%s2627_s8 + $0x30] sm:$0xff]  ;;  %v1906_v29 = vld [vmem:[%s2627_s8 + $0x28] sm:$0xff]  ;;  %v1905_v28 = vld [vmem:[%s2627_s8 + $0x20] sm:$0xff] }
 0xca6   :  { %v1426_v37 = vsel %vm644_vm11, %v1424_v34, %v1955_v51  ;;  %v1427_v38 = vsel %vm644_vm11, %v1425_v33, %v1956_v32  ;;  %v1962_v30 = vld [vmem:[%s2626_s7 + $0x1] ss:$0 sm:$0xff] }
 0xca7   :  { %v1428_v31 = vpack.c.bf16 %v1427_v38, %v1426_v37 }
 0xca8   :  { %1617 = vmatpush.bf16.msrb.mxu2 %v1907_v50 }
 0xca9   :  { %1840 = vmatmul.msk.bf16.vlgmr.msrb.gmra.mxu0 %vm46_vm0, %v1428_v31 }
 0xcac   :  { %1618 = vmatpush.bf16.msrb.mxu2 %v1906_v29 }
 0xcb0   :  { %1619 = vmatpush.bf16.msrb.mxu2 %v1905_v28 }
 0xd26   :  { %v1459_v41 = vpop.f32.mrf.mxu0 }
 0xd27   :  { %v1460_v42 = vadd.f32 %v1459_v41, %v1434_v40 }
 0xd29   :  { %v1464_v36 = vadd.f32 %v1460_v42, %v2406_v19 }
 0xd2b   :  { %v1466_v43 = vsel %vm46_vm0, %v1464_v36, 0.0 }
 0xd2c   :  { %1467 = vadd.xlane.f32.xlu1 %v1466_v43 }
 0xd2e   :  { %v1461_v44 = vpop.f32.mrf.mxu0 }
 0xd2f   :  { %v1462_v45 = vadd.f32 %v1461_v44, %v1434_v40 }
 0xd31   :  { %v1465_v46 = vadd.f32 %v1462_v45, %v2408_v20  ;;  %v1904_v20 = vld [vmem:[%s2625_s6 + $0x18] sm:$0xff] }
 0xd32   :  { %1548 = vmatpush.bf16.msrb.mxu1 %v1904_v20 }
 0xd33   :  { %v1469_v47 = vsel %vm46_vm0, %v1465_v46, 0.0 }
 0xd34   :  { %1470 = vadd.xlane.f32.xlu0 %v1469_v47 }
 0xd36   :  { %1549 = vmatpush.bf16.msrb.mxu1 %v1903_v63 }
 0xd9f   :  { %v1468_v48 = vpop.xlane.xlu1 %1467 }
 0xda0   :  { %v1472_v49 = vmul.f32 %v1468_v48, %v2173_v10 }
 0xda2   :  { %v1474_v52 = vsub.f32 %v1464_v36, %v1472_v49 }
 0xda4   :  { %v1476_v53 = vmul.f32 %v1474_v52, %v1474_v52 }
 0xda6   :  { %v1478_v54 = vsel %vm46_vm0, %v1476_v53, 0.0 }
 0xda7   :  { %v1471_v55 = vpop.xlane.xlu0 %1470  ;;  %1479 = vadd.xlane.f32.xlu2 %v1478_v54 }
 0xda8   :  { %v1473_v19 = vmul.f32 %v1471_v55, %v2173_v10 }
 0xdaa   :  { %v1475_v56 = vsub.f32 %v1465_v46, %v1473_v19 }
 0xdac   :  { %v1477_v57 = vmul.f32 %v1475_v56, %v1475_v56 }
 0xdae   :  { %v1481_v59 = vsel %vm46_vm0, %v1477_v57, 0.0 }
 0xdaf   :  { %1482 = vadd.xlane.f32.xlu1 %v1481_v59 }
 0xe1a   :  { %v1480_v61 = vpop.xlane.xlu2 %1479 }
 0xe1b   :  { %v1484_v2 = vmul.f32 %v1480_v61, %v2173_v10 }
 0xe1d   :  { %v1486_v62 = vadd.f32 1e-12, %v1484_v2 }
 0xe1f   :  { %2046 = vrsqrt.f32 %v1486_v62  ;;  %vm1494_vm9 = vweird.f32 %v1486_v62 }
 0xe22   :  { %v1483_v58 = vpop.xlane.xlu1 %1482 }
 0xe23   :  { %v1485_v0 = vmul.f32 %v1483_v58, %v2173_v10 }
 0xe25   :  { %v2047_v60 = vpop.eup %2046  ;;  %v1487_v1 = vadd.f32 1e-12, %v1485_v0 }
 0xe26   :  { %v1489_v3 = vmul.f32 %v2047_v60, %v1486_v62  ;;  %vm1495_vm8 = vweird.f32 %v2047_v60 }
 0xe27   :  { %2048 = vrsqrt.f32 %v1487_v1  ;;  %vm1496_vm10 = vmor %vm1494_vm9, %vm1495_vm8  ;;  %vm1504_vm14 = vweird.f32 %v1487_v1 }
 0xe28   :  { %v1490_v4 = vmul.f32 %v2047_v60, %v1489_v3 }
 0xe2a   :  { %v1491_v5 = vmul.f32 0.5, %v1490_v4 }
 0xe2c   :  { %v1492_v6 = vsub.f32 1.5, %v1491_v5 }
 0xe2d   :  { %v2049_v7 = vpop.eup %2048 }
 0xe2e   :  { %v1493_v8 = vmul.f32 %v2047_v60, %v1492_v6  ;;  %v1499_v9 = vmul.f32 %v2049_v7, %v1487_v1  ;;  %vm1505_vm11 = vweird.f32 %v2049_v7 }
 0xe2f   :  { %vm1506_vm15 = vmor %vm1504_vm14, %vm1505_vm11 }
 0xe30   :  { %v1500_v11 = vmul.f32 %v2049_v7, %v1499_v9  ;;  %v1497_v12 = vsel %vm1496_vm10, %v2047_v60, %v1493_v8 }
 0xe31   :  { %v1508_v17 = vmul.f32 %v1497_v12, %v1474_v52 }
 0xe32   :  { %v1501_v14 = vmul.f32 0.5, %v1500_v11 }
 0xe33   :  { %v1511_v23 = vmul.f32 %v1510_v16, %v1508_v17 }
 0xe34   :  { %v1502_v15 = vsub.f32 1.5, %v1501_v14  ;;  %v1910_v14 = vld [vmem:[%s2629_s10 + $0x8] sm:$0xff] }
 0xe35   :  { %v1514_v13 = vadd.f32 %v1513_v22, %v1511_v23  ;;  %1713 = vmatpush.bf16.msra.mxu3 %v1910_v14 }
 0xe36   :  { %v1503_v18 = vmul.f32 %v2049_v7, %v1502_v15 }
 0xe38   :  { %v1507_v21 = vsel %vm1506_vm15, %v2049_v7, %v1503_v18 }
 0xe39   :  { %v1509_v24 = vmul.f32 %v1507_v21, %v1475_v56  ;;  %v1584_v56 = vperm.slane %v2557_v39, 3 }
 0xe3b   :  { %v1512_v25 = vmul.f32 %v1510_v16, %v1509_v24  ;;  %v1909_v16 = vld [vmem:[%s2629_s10] sm:$0xff] }
 0xe3c   :  { %1714 = vmatpush.bf16.msra.mxu3 %v1909_v16 }
 0xe3d   :  { %v1515_v26 = vadd.f32 %v1513_v22, %v1512_v25 }
 0xe3f   :  { %v1516_v35 = vpack.c.bf16 %v1515_v26, %v1514_v13 }
 0xe41   :  { %1854 = vmatmul.msk.bf16.vlgmr.msrb.gmra.mxu1 %vm46_vm0, %v1516_v35 }
 0xebe   :  { %v1551_v32 = vpop.f32.mrf.mxu1 }
 0xebf   :  { %v1552_v51 = vadd.f32 %v1962_v30, %v1551_v32 }
 0xec1   :  { %v1558_v33 = vmul.f32 0.044715, %v1552_v51  ;;  %v1556_v49 = vmul.f32 0.5, %v1552_v51 }
 0xec3   :  { %v1560_v34 = vmul.f32 %v1558_v33, %v1552_v51 }
 0xec5   :  { %v1562_v37 = vmul.f32 %v1560_v34, %v1552_v51 }
 0xec6   :  { %v1553_v38 = vpop.f32.mrf.mxu1 }
 0xec7   :  { %v1564_v31 = vadd.f32 %v1562_v37, %v1552_v51  ;;  %v1554_v40 = vadd.f32 %v1962_v30, %v1553_v38  ;;  %v1675_v37 = vperm.slane %v2557_v39, 5 }
 0xec9   :  { %v1559_v41 = vmul.f32 0.044715, %v1554_v40  ;;  %v1566_v42 = vmul.f32 0.7978846, %v1564_v31  ;;  %v1557_v52 = vmul.f32 0.5, %v1554_v40 }
 0xecb   :  { %v1561_v36 = vmul.f32 %v1559_v41, %v1554_v40  ;;  %2050 = vtanh.f32 %v1566_v42 }
 0xecd   :  { %v1563_v43 = vmul.f32 %v1561_v36, %v1554_v40 }
 0xecf   :  { %v1565_v44 = vadd.f32 %v1563_v43, %v1554_v40 }
 0xed1   :  { %v1567_v45 = vmul.f32 0.7978846, %v1565_v44  ;;  %v2051_v46 = vpop.eup %2050  ;;  %v1963_v44 = vld [vmem:[%s2630_s11] ss:$0 sm:$0xff] }
 0xed2   :  { %v1570_v47 = vadd.f32 1.0, %v2051_v46 }
 0xed3   :  { %2052 = vtanh.f32 %v1567_v45 }
 0xed4   :  { %v1572_v54 = vmul.f32 %v1570_v47, %v1556_v49 }
 0xed9   :  { %v2053_v48 = vpop.eup %2052 }
 0xeda   :  { %v1571_v53 = vadd.f32 1.0, %v2053_v48 }
 0xedc   :  { %v1573_v55 = vmul.f32 %v1571_v53, %v1557_v52 }
 0xede   :  { %v1574_v19 = vpack.c.bf16 %v1573_v55, %v1572_v54 }
 0xee0   :  { %1879 = vmatmul.msk.bf16.vlgmr.msrb.gmra.mxu2 %vm824_vm3, %v1574_v19 }
 0xf63   :  { %v1621_v57 = vpop.f32.mrf.mxu2 }
 0xf64   :  { %v1622_v59 = vadd.f32 %v1621_v57, %v1584_v56 }
 0xf66   :  { %v1626_v20 = vadd.f32 %v1622_v59, %v1514_v13 }
 0xf68   :  { %v1628_v61 = vsel %vm46_vm0, %v1626_v20, 0.0 }
 0xf69   :  { %1629 = vadd.xlane.f32.xlu1 %v1628_v61 }
 0xf6b   :  { %v1623_v2 = vpop.f32.mrf.mxu2 }
 0xf6c   :  { %v1624_v62 = vadd.f32 %v1623_v2, %v1584_v56 }
 0xf6e   :  { %v1627_v63 = vadd.f32 %v1624_v62, %v1515_v26 }
 0xf70   :  { %v1631_v58 = vsel %vm46_vm0, %v1627_v63, 0.0 }
 0xf71   :  { %1632 = vadd.xlane.f32.xlu0 %v1631_v58 }
 0xfdc   :  { %v1630_v0 = vpop.xlane.xlu1 %1629 }
 0xfdd   :  { %v1634_v60 = vmul.f32 %v1630_v0, %v2173_v10 }
 0xfdf   :  { %v1636_v1 = vsub.f32 %v1626_v20, %v1634_v60 }
 0xfe1   :  { %v1638_v3 = vmul.f32 %v1636_v1, %v1636_v1 }
 0xfe3   :  { %v1640_v4 = vsel %vm46_vm0, %v1638_v3, 0.0 }
 0xfe4   :  { %v1633_v5 = vpop.xlane.xlu0 %1632  ;;  %1641 = vadd.xlane.f32.xlu1 %v1640_v4 }
 0xfe5   :  { %v1635_v6 = vmul.f32 %v1633_v5, %v2173_v10 }
 0xfe7   :  { %v1637_v7 = vsub.f32 %v1627_v63, %v1635_v6 }
 0xfe9   :  { %v1639_v8 = vmul.f32 %v1637_v7, %v1637_v7 }
 0xfeb   :  { %v1643_v9 = vsel %vm46_vm0, %v1639_v8, 0.0 }
 0xfec   :  { %1644 = vadd.xlane.f32.xlu0 %v1643_v9 }
0x1057   :  { %v1642_v11 = vpop.xlane.xlu1 %1641 }
0x1058   :  { %v1646_v12 = vmul.f32 %v1642_v11, %v2173_v10 }
0x105a   :  { %v1648_v15 = vadd.f32 1e-12, %v1646_v12 }
0x105c   :  { %2054 = vrsqrt.f32 %v1648_v15  ;;  %vm1656_vm2 = vweird.f32 %v1648_v15 }
0x105f   :  { %v1645_v17 = vpop.xlane.xlu0 %1644 }
0x1060   :  { %v1647_v18 = vmul.f32 %v1645_v17, %v2173_v10  ;;  %v1672_v10 = vperm.slane %v2557_v39, 4 }
0x1062   :  { %v2055_v21 = vpop.eup %2054  ;;  %v1649_v22 = vadd.f32 1e-12, %v1647_v18 }
0x1063   :  { %v1651_v23 = vmul.f32 %v2055_v21, %v1648_v15  ;;  %vm1657_vm1 = vweird.f32 %v2055_v21 }
0x1064   :  { %2056 = vrsqrt.f32 %v1649_v22  ;;  %vm1658_vm3 = vmor %vm1656_vm2, %vm1657_vm1  ;;  %vm1666_vm5 = vweird.f32 %v1649_v22 }
0x1065   :  { %v1652_v24 = vmul.f32 %v2055_v21, %v1651_v23 }
0x1067   :  { %v1653_v25 = vmul.f32 0.5, %v1652_v24 }
0x1069   :  { %v1654_v13 = vsub.f32 1.5, %v1653_v25 }
0x106a   :  { %v2057_v26 = vpop.eup %2056 }
0x106b   :  { %v1661_v35 = vmul.f32 %v2057_v26, %v1649_v22  ;;  %v1655_v27 = vmul.f32 %v2055_v21, %v1654_v13  ;;  %vm1667_vm4 = vweird.f32 %v2057_v26 }
0x106c   :  { %vm1668_vm6 = vmor %vm1666_vm5, %vm1667_vm4 }
0x106d   :  { %v1662_v50 = vmul.f32 %v2057_v26, %v1661_v35  ;;  %v1659_v28 = vsel %vm1658_vm3, %v2055_v21, %v1655_v27 }
0x106e   :  { %v1670_v51 = vmul.f32 %v1659_v28, %v1636_v1 }
0x106f   :  { %v1663_v29 = vmul.f32 0.5, %v1662_v50 }
0x1070   :  { %v1673_v38 = vmul.f32 %v1672_v10, %v1670_v51 }
0x1071   :  { %v1664_v30 = vsub.f32 1.5, %v1663_v29 }
0x1072   :  { %v1676_v41 = vadd.f32 %v1675_v37, %v1673_v38 }
0x1073   :  { %v1665_v32 = vmul.f32 %v2057_v26, %v1664_v30 }
0x1075   :  { %v1669_v33 = vsel %vm1668_vm6, %v2057_v26, %v1665_v32 }
0x1076   :  { %v1671_v34 = vmul.f32 %v1669_v33, %v1637_v7 }
0x1078   :  { %v1674_v31 = vmul.f32 %v1672_v10, %v1671_v34 }
0x107a   :  { %v1677_v40 = vadd.f32 %v1675_v37, %v1674_v31 }
0x107c   :  { %v1679_v42 = vrot.slane %v1677_v40, 7 }
0x107e   :  { %v1682_v36 = vsel %vm1681_vm7, %v1676_v41, %v1679_v42 }
0x107f   :  { %v1683_v43 = vpack.c.bf16 %v1682_v36, %v1682_v36 }
0x1081   :  { %1888 = vmatmul.msk.bf16.vlgmr.msra.gmra.mxu3 %vm46_vm0, %v1683_v43 }
0x1104   :  { %v1716_v39 = vpop.f32.mrf.mxu3 }
0x1105   :  { %v1717_v45 = vadd.f32 %v1963_v44, %v1716_v39 }
0x1107   :  { %1720 = vst [vmem:[#allocation2] sm:$0x3] %v1717_v45 }
0x1108   :  { %1731 = dma.vmem_to_hbm [thread:$0]  %s1727_s13, 32, %s1729_s16, [#allocation3]  }
0x110c   :  { %v1718_v46 = vpop.f32.mrf.mxu3 }
0x110d   :  { %2082 = dma.done.wait [#allocation3], 32  }
0x110e   :  { %2083 = vsyncadd [#allocation3], 4294967264 }
0x110f   :  { %1736 = vsyncpa [#allocation3], 1 }

</bundles_post_ra>
